<compile_context>
chip_gen: v7x
topology: tpu7x:2x2x1
jax: 0.10.0
libtpu: 0.0.40
codegen_flags: <defaults>
</compile_context>

<pallas_src>
import math

import jax
import jax.numpy as jnp
from jax.experimental import pallas as pl
from jax.experimental.pallas import tpu as pltpu

K = 5           # conv kernel size (conv1 / conv2)
BN_EPS = 1e-5


def _conv1d_valid(a, w, bias):
    """Valid conv along axis 1 via im2col: one MXU matmul with contraction K*C.

    a:    (B, L, C)   activations, ALREADY in the MXU dtype (bf16 on >=v5, f32 otherwise)
    w:    (K*C, H)    conv weight in the MXU dtype
    bias: (1, H)      f32 bias
    returns (B, L-K+1, H) f32
    """
    b, l, c = a.shape
    lout = l - (K - 1)
    h = w.shape[1]
    # Stack the K shifted length-slices along the lane (channel) axis so the five tiny
    # per-tap matmuls collapse into one wide contraction.  `a` is already in the MXU
    # dtype, so the shifted copies move half the bytes of the previous version.
    # TODO(synk): at production lengths build these shifted views with pltpu.roll on an
    # 8-padded length (XLU slot, unmasked stores) instead of misaligned sublane slices,
    # and pad the contraction (K*C) to the MXU tile (128 / 256); at these toy shapes the
    # slice copies are negligible and the aligned path is not exercised here.
    cols = jnp.concatenate([a[:, k:k + lout, :] for k in range(K)], axis=-1)
    y = jnp.dot(cols.reshape(b * lout, K * c), w,
                preferred_element_type=jnp.float32).reshape(b, lout, h)
    return y + bias.astype(jnp.float32).reshape(1, 1, h)


def _relu_bn_train(y, g, be):
    """ReLU fused with one-pass training-mode BatchNorm1d over (batch, length).

    y: (B, L, H) f32;  g, be: (1, H) f32.
    """
    a = jnp.maximum(y, 0.0)
    n = a.shape[0] * a.shape[1]
    s = jnp.sum(a, axis=(0, 1), keepdims=True)
    ssq = jnp.sum(a * a, axis=(0, 1), keepdims=True)
    mu = s * (1.0 / n)
    # NOTE: biased one-pass variance E[x^2]-mu^2 (clamped); switch to two-pass stats when
    # the batch grid is introduced for production shapes.
    var = jnp.maximum(ssq * (1.0 / n) - mu * mu, 0.0)
    return (a - mu) * jax.lax.rsqrt(var + BN_EPS) * g.reshape(1, 1, -1) + be.reshape(1, 1, -1)


def cnn_kernel(x_ref, w1_ref, w2_ref, wpa_ref, pp_ref, out_ref):
    n_out = out_ref.shape[1]
    x = x_ref[...]                                   # (B, T, Cin), MXU dtype
    batch = x.shape[0]
    h = w1_ref.shape[1]

    # Packed per-channel params: one (8, W) f32 slab -> single DMA / single VMEM tile.
    pp = pp_ref[...]
    b1, g1, be1 = pp[0:1, :h], pp[1:2, :h], pp[2:3, :h]
    b2, g2, be2 = pp[3:4, :h], pp[4:5, :h], pp[5:6, :h]
    bpa = pp[6:7, :n_out + 1]

    # ---- conv1 (k=5, valid) -> ReLU -> BN (batch statistics) -----------------
    a1 = _relu_bn_train(_conv1d_valid(x, w1_ref[...], b1), g1, be1)
    # TODO(synk): F.dropout omitted — do_prob=0.0 makes it an identity op.

    # ---- MaxPool1d(kernel_size=2, stride=2), floor mode ----------------------
    # TODO(synk): at production L replace the (p,2) sublane split with two strided
    # sublane views + jnp.maximum (pure VPU, no materialized interleave copy).
    p = a1.shape[1] // 2
    a1p = jnp.max(a1[:, :2 * p, :].reshape(batch, p, 2, a1.shape[2]), axis=2)

    # ---- conv2 (k=5, valid) -> ReLU -> BN ------------------------------------
    # Cast ONCE to the MXU dtype before the im2col build (not per shifted slice).
    a2 = _relu_bn_train(
        _conv1d_valid(a1p.astype(w2_ref.dtype), w2_ref[...], b2), g2, be2)
    l2 = a2.shape[1]

    # ---- fused 1x1 convs: [prediction | attention-logit] in one matmul -------
    # (kept f32: contraction is only H and the extra precision protects the tail)
    pa = jnp.dot(a2.reshape(batch * l2, h), wpa_ref[...],
                 preferred_element_type=jnp.float32).reshape(batch, l2, n_out + 1)
    pa = pa + bpa.reshape(1, 1, n_out + 1)
    pred = pa[:, :, :n_out]                          # (B, L2, n_out)
    logits = pa[:, :, n_out:]                        # (B, L2, 1)

    # ---- softmax over length fused with the weighted mean --------------------
    #   edge_prob = mean_l(pred * softmax(logits)) = (e . pred) / (sum_l e * L2)
    # VPU multiply + sublane reduce (no degenerate M=1 MXU push); the combined
    # denominator/length scale goes through the EUP approximate reciprocal.
    e = jnp.exp(logits - jnp.max(logits, axis=1, keepdims=True))   # (B, L2, 1)
    denom = jnp.sum(e, axis=1)                                     # (B, 1)
    weighted = jnp.sum(e * pred, axis=1)                           # (B, n_out)
    scale = pl.reciprocal(denom * float(l2), approx=True)          # (B, 1)
    out_ref[...] = (weighted * scale).astype(out_ref.dtype)


def _mxu_dtype():
    """bf16 MXU inputs on every bf16-native MXU (v5e and newer); f32 on v2/v3/v4 or non-TPU."""
    try:
        kind = jax.devices()[0].device_kind.lower()
    except Exception:
        return jnp.float32
    if "tpu" not in kind:
        return jnp.float32
    if any(old in kind for old in ("v2", "v3", "v4")):
        return jnp.float32
    return jnp.bfloat16


def init_params(n_in, n_hid, n_out, key):
    """Deterministic init mirroring CNN.init_weights (normal(0, sqrt(2/(k*C_out))), bias=0.1)."""
    ks = jax.random.split(key, 4)
    p = {}
    p["w1"] = jax.random.normal(ks[0], (K, n_in, n_hid), jnp.float32) * math.sqrt(2.0 / (K * n_hid))
    p["b1"] = jnp.full((1, n_hid), 0.1, jnp.float32)
    p["w2"] = jax.random.normal(ks[1], (K, n_hid, n_hid), jnp.float32) * math.sqrt(2.0 / (K * n_hid))
    p["b2"] = jnp.full((1, n_hid), 0.1, jnp.float32)
    p["wp"] = jax.random.normal(ks[2], (n_hid, n_out), jnp.float32) * math.sqrt(2.0 / (1 * n_out))
    p["bp"] = jnp.full((1, n_out), 0.1, jnp.float32)
    p["wa"] = jax.random.normal(ks[3], (n_hid, 1), jnp.float32) * math.sqrt(2.0 / (1 * 1))
    p["ba"] = jnp.full((1, 1), 0.1, jnp.float32)
    # BatchNorm affine params: weight=1, bias=0
    p["g1"] = jnp.ones((1, n_hid), jnp.float32)
    p["be1"] = jnp.zeros((1, n_hid), jnp.float32)
    p["g2"] = jnp.ones((1, n_hid), jnp.float32)
    p["be2"] = jnp.zeros((1, n_hid), jnp.float32)
    return p


def prepare_params(p, mxu_dtype):
    """One-time weight preprocessing (hoisted out of the per-call forward path).

    Flattens conv weights for the im2col matmuls, fuses the two 1x1 heads, and packs the
    seven tiny per-channel vectors into one (8, W) f32 slab (single DMA / VMEM tile).
    """
    n_in, n_hid = p["w1"].shape[1], p["w1"].shape[2]
    n_out = p["wp"].shape[1]
    w1 = p["w1"].reshape(K * n_in, n_hid).astype(mxu_dtype)
    w2 = p["w2"].reshape(K * n_hid, n_hid).astype(mxu_dtype)
    wpa = jnp.concatenate([p["wp"], p["wa"]], axis=1).astype(jnp.float32)   # (H, n_out+1)
    bpa = jnp.concatenate([p["bp"], p["ba"]], axis=1)                       # (1, n_out+1)

    width = max(n_hid, n_out + 1)

    def row(v):
        v = v.reshape(1, -1).astype(jnp.float32)
        return jnp.pad(v, ((0, 0), (0, width - v.shape[1])))

    pp = jnp.concatenate(
        [row(p["b1"]), row(p["g1"]), row(p["be1"]),
         row(p["b2"]), row(p["g2"]), row(p["be2"]),
         row(bpa), jnp.zeros((1, width), jnp.float32)], axis=0)             # (8, W)

    return {"w1": w1, "w2": w2, "wpa": wpa, "pp": pp,
            "n_in": n_in, "n_hid": n_hid, "n_out": n_out}


def cnn_forward(x_ncl, prep, *, mxu_dtype=None):
    """x_ncl: (B, n_in, T) in PyTorch NCL layout. Returns edge_prob of shape (B, n_out)."""
    if mxu_dtype is None:
        mxu_dtype = prep["w1"].dtype
    # Feed the kernel (B, T, n_in) already in the MXU dtype: bf16 halves the input DMA.
    # TODO(synk): at production B/T fold this NCL->NLC transpose into the kernel (XLU)
    # or the input BlockSpec to remove the standalone XLA transpose round-trip.
    x = jnp.transpose(x_ncl, (0, 2, 1)).astype(mxu_dtype)       # (B, T, n_in)
    B, T, _ = x.shape
    n_hid, n_out = prep["n_hid"], prep["n_out"]
    n_in = prep["n_in"]
    L1 = T - (K - 1)
    L2 = L1 // 2 - (K - 1)

    args = (x, prep["w1"], prep["w2"], prep["wpa"], prep["pp"])

    flops = (2 * B * L1 * (K * n_in) * n_hid          # conv1 im2col matmul
             + 2 * B * L2 * (K * n_hid) * n_hid       # conv2 im2col matmul
             + 2 * B * L2 * n_hid * (n_out + 1)       # fused 1x1 heads
             + 2 * B * L2 * n_out)                    # attention-weighted mean
    transcendentals = B * L2 + B + 2 * n_hid          # softmax exps + reciprocals + BN rsqrts
    bytes_accessed = int(sum(a.size * a.dtype.itemsize for a in args)) + B * n_out * 4

    vmem = pl.BlockSpec(memory_space=pltpu.MemorySpace.VMEM)
    # TODO(synk): at production batch sizes add a ("parallel",) batch grid axis with
    # two-pass (cross-block) BatchNorm statistics so both v7x TensorCores are used and
    # the per-core resident set stays under v7x's 64 MiB VMEM; at B=2 the single
    # gridless call wins.
    return pl.pallas_call(
        cnn_kernel,
        out_shape=jax.ShapeDtypeStruct((B, n_out), jnp.float32),
        in_specs=[vmem] * len(args),
        out_specs=vmem,
        compiler_params=pltpu.CompilerParams(
            # Sized with headroom for these shapes while staying well under v7x's
            # 64 MiB physical VMEM (<= ~40 MiB leaves room for compiler scratch).
            vmem_limit_bytes=32 * 1024 * 1024,
        ),
        cost_estimate=pl.CostEstimate(flops=flops,
                                      transcendentals=transcendentals,
                                      bytes_accessed=bytes_accessed),
    )(*args)


def reference(x_ncl, p):
    """Pure-JAX f32 reference of the PyTorch forward (NCL layout), for sanity checking."""
    def conv1d(x, w_kio, b):
        w = jnp.transpose(w_kio, (2, 1, 0))                  # -> (Cout, Cin, K)
        y = jax.lax.conv_general_dilated(x, w, window_strides=(1,), padding="VALID",
                                         dimension_numbers=("NCH", "OIH", "NCH"))
        return y + b.reshape(1, -1, 1)

    def bn(x, g, be):
        mu = jnp.mean(x, axis=(0, 2), keepdims=True)
        var = jnp.mean((x - mu) ** 2, axis=(0, 2), keepdims=True)
        return (x - mu) / jnp.sqrt(var + BN_EPS) * g.reshape(1, -1, 1) + be.reshape(1, -1, 1)

    x = jax.nn.relu(conv1d(x_ncl, p["w1"], p["b1"]))
    x = bn(x, p["g1"], p["be1"])
    B, C, L = x.shape
    P = L // 2
    x = jnp.max(x[:, :, :2 * P].reshape(B, C, P, 2), axis=3)
    x = jax.nn.relu(conv1d(x, p["w2"], p["b2"]))
    x = bn(x, p["g2"], p["be2"])
    pred = jnp.einsum("bcl,co->bol", x, p["wp"]) + p["bp"].reshape(1, -1, 1)
    att = jnp.einsum("bcl,co->bol", x, p["wa"]) + p["ba"].reshape(1, -1, 1)
    att = jax.nn.softmax(att, axis=2)
    return jnp.mean(pred * att, axis=2)


if __name__ == "__main__":
    B, n_in, n_hid, n_out, T = 2, 4, 32, 8, 24   # T=24 -> conv1: 20 -> pool: 10 -> conv2: 6

    key = jax.random.PRNGKey(0)
    kx, kp = jax.random.split(key)
    x = jax.random.normal(kx, (B, n_in, T), jnp.float32)     # PyTorch NCL input
    params = init_params(n_in, n_hid, n_out, kp)

    mxu_dtype = _mxu_dtype()
    prep = prepare_params(params, mxu_dtype)                 # one-time weight prep (hoisted)

    out = cnn_forward(x, prep, mxu_dtype=mxu_dtype)
    out = jax.block_until_ready(out)

    ref = reference(x, params)
    assert out.shape == (B, n_out)
    # bf16 MXU inputs (v5e and newer) are an intentional accuracy/perf trade -> looser tol.
    tol = 2e-2 if mxu_dtype == jnp.float32 else 5e-2
    assert jnp.allclose(out, ref, rtol=tol, atol=tol), (out, ref)

    print("KERNEL_OK")
</pallas_src>

<mosaic_0001>
module attributes {stable_mosaic.version = 11 : i64} {
  func.func @cnn_kernel(%arg0: memref<2x24x4xf32, #tpu.memory_space<vmem>>, %arg1: memref<20x32xf32, #tpu.memory_space<vmem>>, %arg2: memref<160x32xf32, #tpu.memory_space<vmem>>, %arg3: memref<32x9xf32, #tpu.memory_space<vmem>>, %arg4: memref<8x32xf32, #tpu.memory_space<vmem>>, %arg5: memref<2x8xf32, #tpu.memory_space<vmem>>) attributes {dimension_semantics = [], scalar_prefetch = 0 : i64, scratch_operands = 0 : i64, tpu.core_type = #tpu.core_type<tc>} {
    %c0 = arith.constant 0 : index
    %c0_0 = arith.constant 0 : index
    %c0_1 = arith.constant 0 : index
    %0 = vector.load %arg0[%c0, %c0_0, %c0_1] : memref<2x24x4xf32, #tpu.memory_space<vmem>>, vector<2x24x4xf32>
    %c0_2 = arith.constant 0 : index
    %c0_3 = arith.constant 0 : index
    %1 = vector.load %arg4[%c0_2, %c0_3] : memref<8x32xf32, #tpu.memory_space<vmem>>, vector<8x32xf32>
    %2 = vector.extract_strided_slice %1 {offsets = [0, 0], sizes = [1, 32], strides = [1, 1]} : vector<8x32xf32> to vector<1x32xf32>
    %3 = vector.extract_strided_slice %1 {offsets = [1, 0], sizes = [1, 32], strides = [1, 1]} : vector<8x32xf32> to vector<1x32xf32>
    %4 = vector.extract_strided_slice %1 {offsets = [2, 0], sizes = [1, 32], strides = [1, 1]} : vector<8x32xf32> to vector<1x32xf32>
    %5 = vector.extract_strided_slice %1 {offsets = [3, 0], sizes = [1, 32], strides = [1, 1]} : vector<8x32xf32> to vector<1x32xf32>
    %6 = vector.extract_strided_slice %1 {offsets = [4, 0], sizes = [1, 32], strides = [1, 1]} : vector<8x32xf32> to vector<1x32xf32>
    %7 = vector.extract_strided_slice %1 {offsets = [5, 0], sizes = [1, 32], strides = [1, 1]} : vector<8x32xf32> to vector<1x32xf32>
    %8 = vector.extract_strided_slice %1 {offsets = [6, 0], sizes = [1, 9], strides = [1, 1]} : vector<8x32xf32> to vector<1x9xf32>
    %c0_4 = arith.constant 0 : index
    %c0_5 = arith.constant 0 : index
    %9 = vector.load %arg1[%c0_4, %c0_5] : memref<20x32xf32, #tpu.memory_space<vmem>>, vector<20x32xf32>
    %10 = vector.extract_strided_slice %0 {offsets = [0, 0, 0], sizes = [2, 20, 4], strides = [1, 1, 1]} : vector<2x24x4xf32> to vector<2x20x4xf32>
    %11 = vector.extract_strided_slice %0 {offsets = [0, 1, 0], sizes = [2, 20, 4], strides = [1, 1, 1]} : vector<2x24x4xf32> to vector<2x20x4xf32>
    %12 = vector.extract_strided_slice %0 {offsets = [0, 2, 0], sizes = [2, 20, 4], strides = [1, 1, 1]} : vector<2x24x4xf32> to vector<2x20x4xf32>
    %13 = vector.extract_strided_slice %0 {offsets = [0, 3, 0], sizes = [2, 20, 4], strides = [1, 1, 1]} : vector<2x24x4xf32> to vector<2x20x4xf32>
    %14 = vector.extract_strided_slice %0 {offsets = [0, 4, 0], sizes = [2, 20, 4], strides = [1, 1, 1]} : vector<2x24x4xf32> to vector<2x20x4xf32>
    %15 = tpu.concatenate %10, %11, %12, %13, %14 in 2 : vector<2x20x4xf32>, vector<2x20x4xf32>, vector<2x20x4xf32>, vector<2x20x4xf32>, vector<2x20x4xf32> -> vector<2x20x20xf32>
    %16 = vector.shape_cast %15 : vector<2x20x20xf32> to vector<40x20xf32>
    %cst = arith.constant dense<0.000000e+00> : vector<40x32xf32>
    %17 = tpu.matmul %16, %9, %cst {dimension_numbers = #tpu.dot_dimension_numbers<[1], [0], [0], [1], [0, 0, 1, 1], [], []>} : vector<40x20xf32>, vector<20x32xf32>, vector<40x32xf32> -> vector<40x32xf32>
    %18 = vector.shape_cast %17 : vector<40x32xf32> to vector<2x20x32xf32>
    %19 = vector.shape_cast %2 : vector<1x32xf32> to vector<1x1x32xf32>
    %20 = vector.broadcast %19 : vector<1x1x32xf32> to vector<2x20x32xf32>
    %21 = arith.addf %18, %20 : vector<2x20x32xf32>
    %cst_6 = arith.constant 0.000000e+00 : f32
    %22 = vector.broadcast %cst_6 : f32 to vector<2x20x32xf32>
    %23 = arith.maximumf %21, %22 : vector<2x20x32xf32>
    %cst_7 = arith.constant dense<0.000000e+00> : vector<32xf32>
    %24 = vector.multi_reduction <add>, %23, %cst_7 [0, 1] : vector<2x20x32xf32> to vector<32xf32>
    %25 = vector.shape_cast %24 : vector<32xf32> to vector<1x1x32xf32>
    %26 = arith.mulf %23, %23 : vector<2x20x32xf32>
    %cst_8 = arith.constant dense<0.000000e+00> : vector<32xf32>
    %27 = vector.multi_reduction <add>, %26, %cst_8 [0, 1] : vector<2x20x32xf32> to vector<32xf32>
    %28 = vector.shape_cast %27 : vector<32xf32> to vector<1x1x32xf32>
    %cst_9 = arith.constant 2.500000e-02 : f32
    %29 = vector.broadcast %cst_9 : f32 to vector<1x1x32xf32>
    %30 = arith.mulf %25, %29 : vector<1x1x32xf32>
    %cst_10 = arith.constant 2.500000e-02 : f32
    %31 = vector.broadcast %cst_10 : f32 to vector<1x1x32xf32>
    %32 = arith.mulf %28, %31 : vector<1x1x32xf32>
    %33 = arith.mulf %30, %30 : vector<1x1x32xf32>
    %34 = arith.subf %32, %33 : vector<1x1x32xf32>
    %cst_11 = arith.constant 0.000000e+00 : f32
    %35 = vector.broadcast %cst_11 : f32 to vector<1x1x32xf32>
    %36 = arith.maximumf %34, %35 : vector<1x1x32xf32>
    %37 = vector.broadcast %30 : vector<1x1x32xf32> to vector<2x20x32xf32>
    %38 = arith.subf %23, %37 : vector<2x20x32xf32>
    %cst_12 = arith.constant 9.99999974E-6 : f32
    %39 = vector.broadcast %cst_12 : f32 to vector<1x1x32xf32>
    %40 = arith.addf %36, %39 : vector<1x1x32xf32>
    %41 = math.rsqrt %40 : vector<1x1x32xf32>
    %42 = vector.broadcast %41 : vector<1x1x32xf32> to vector<2x20x32xf32>
    %43 = arith.mulf %38, %42 : vector<2x20x32xf32>
    %44 = vector.shape_cast %3 : vector<1x32xf32> to vector<1x1x32xf32>
    %45 = vector.broadcast %44 : vector<1x1x32xf32> to vector<2x20x32xf32>
    %46 = arith.mulf %43, %45 : vector<2x20x32xf32>
    %47 = vector.shape_cast %4 : vector<1x32xf32> to vector<1x1x32xf32>
    %48 = vector.broadcast %47 : vector<1x1x32xf32> to vector<2x20x32xf32>
    %49 = arith.addf %46, %48 : vector<2x20x32xf32>
    %50 = vector.shape_cast %49 : vector<2x20x32xf32> to vector<2x10x2x32xf32>
    %cst_13 = arith.constant dense<0xFF800000> : vector<2x10x32xf32>
    %51 = vector.multi_reduction <maximumf>, %50, %cst_13 [2] : vector<2x10x2x32xf32> to vector<2x10x32xf32>
    %c0_14 = arith.constant 0 : index
    %c0_15 = arith.constant 0 : index
    %52 = vector.load %arg2[%c0_14, %c0_15] : memref<160x32xf32, #tpu.memory_space<vmem>>, vector<160x32xf32>
    %53 = vector.extract_strided_slice %51 {offsets = [0, 0, 0], sizes = [2, 6, 32], strides = [1, 1, 1]} : vector<2x10x32xf32> to vector<2x6x32xf32>
    %54 = vector.extract_strided_slice %51 {offsets = [0, 1, 0], sizes = [2, 6, 32], strides = [1, 1, 1]} : vector<2x10x32xf32> to vector<2x6x32xf32>
    %55 = vector.extract_strided_slice %51 {offsets = [0, 2, 0], sizes = [2, 6, 32], strides = [1, 1, 1]} : vector<2x10x32xf32> to vector<2x6x32xf32>
    %56 = vector.extract_strided_slice %51 {offsets = [0, 3, 0], sizes = [2, 6, 32], strides = [1, 1, 1]} : vector<2x10x32xf32> to vector<2x6x32xf32>
    %57 = vector.extract_strided_slice %51 {offsets = [0, 4, 0], sizes = [2, 6, 32], strides = [1, 1, 1]} : vector<2x10x32xf32> to vector<2x6x32xf32>
    %58 = tpu.concatenate %53, %54, %55, %56, %57 in 2 : vector<2x6x32xf32>, vector<2x6x32xf32>, vector<2x6x32xf32>, vector<2x6x32xf32>, vector<2x6x32xf32> -> vector<2x6x160xf32>
    %59 = vector.shape_cast %58 : vector<2x6x160xf32> to vector<12x160xf32>
    %cst_16 = arith.constant dense<0.000000e+00> : vector<12x32xf32>
    %60 = tpu.matmul %59, %52, %cst_16 {dimension_numbers = #tpu.dot_dimension_numbers<[1], [0], [0], [1], [0, 0, 1, 1], [], []>} : vector<12x160xf32>, vector<160x32xf32>, vector<12x32xf32> -> vector<12x32xf32>
    %61 = vector.shape_cast %60 : vector<12x32xf32> to vector<2x6x32xf32>
    %62 = vector.shape_cast %5 : vector<1x32xf32> to vector<1x1x32xf32>
    %63 = vector.broadcast %62 : vector<1x1x32xf32> to vector<2x6x32xf32>
    %64 = arith.addf %61, %63 : vector<2x6x32xf32>
    %cst_17 = arith.constant 0.000000e+00 : f32
    %65 = vector.broadcast %cst_17 : f32 to vector<2x6x32xf32>
    %66 = arith.maximumf %64, %65 : vector<2x6x32xf32>
    %cst_18 = arith.constant dense<0.000000e+00> : vector<32xf32>
    %67 = vector.multi_reduction <add>, %66, %cst_18 [0, 1] : vector<2x6x32xf32> to vector<32xf32>
    %68 = vector.shape_cast %67 : vector<32xf32> to vector<1x1x32xf32>
    %69 = arith.mulf %66, %66 : vector<2x6x32xf32>
    %cst_19 = arith.constant dense<0.000000e+00> : vector<32xf32>
    %70 = vector.multi_reduction <add>, %69, %cst_19 [0, 1] : vector<2x6x32xf32> to vector<32xf32>
    %71 = vector.shape_cast %70 : vector<32xf32> to vector<1x1x32xf32>
    %cst_20 = arith.constant 0.0833333358 : f32
    %72 = vector.broadcast %cst_20 : f32 to vector<1x1x32xf32>
    %73 = arith.mulf %68, %72 : vector<1x1x32xf32>
    %cst_21 = arith.constant 0.0833333358 : f32
    %74 = vector.broadcast %cst_21 : f32 to vector<1x1x32xf32>
    %75 = arith.mulf %71, %74 : vector<1x1x32xf32>
    %76 = arith.mulf %73, %73 : vector<1x1x32xf32>
    %77 = arith.subf %75, %76 : vector<1x1x32xf32>
    %cst_22 = arith.constant 0.000000e+00 : f32
    %78 = vector.broadcast %cst_22 : f32 to vector<1x1x32xf32>
    %79 = arith.maximumf %77, %78 : vector<1x1x32xf32>
    %80 = vector.broadcast %73 : vector<1x1x32xf32> to vector<2x6x32xf32>
    %81 = arith.subf %66, %80 : vector<2x6x32xf32>
    %cst_23 = arith.constant 9.99999974E-6 : f32
    %82 = vector.broadcast %cst_23 : f32 to vector<1x1x32xf32>
    %83 = arith.addf %79, %82 : vector<1x1x32xf32>
    %84 = math.rsqrt %83 : vector<1x1x32xf32>
    %85 = vector.broadcast %84 : vector<1x1x32xf32> to vector<2x6x32xf32>
    %86 = arith.mulf %81, %85 : vector<2x6x32xf32>
    %87 = vector.shape_cast %6 : vector<1x32xf32> to vector<1x1x32xf32>
    %88 = vector.broadcast %87 : vector<1x1x32xf32> to vector<2x6x32xf32>
    %89 = arith.mulf %86, %88 : vector<2x6x32xf32>
    %90 = vector.shape_cast %7 : vector<1x32xf32> to vector<1x1x32xf32>
    %91 = vector.broadcast %90 : vector<1x1x32xf32> to vector<2x6x32xf32>
    %92 = arith.addf %89, %91 : vector<2x6x32xf32>
    %93 = vector.shape_cast %92 : vector<2x6x32xf32> to vector<12x32xf32>
    %c0_24 = arith.constant 0 : index
    %c0_25 = arith.constant 0 : index
    %94 = vector.load %arg3[%c0_24, %c0_25] : memref<32x9xf32, #tpu.memory_space<vmem>>, vector<32x9xf32>
    %cst_26 = arith.constant dense<0.000000e+00> : vector<12x9xf32>
    %95 = tpu.matmul %93, %94, %cst_26 {dimension_numbers = #tpu.dot_dimension_numbers<[1], [0], [0], [1], [0, 0, 1, 1], [], []>} : vector<12x32xf32>, vector<32x9xf32>, vector<12x9xf32> -> vector<12x9xf32>
    %96 = vector.shape_cast %95 : vector<12x9xf32> to vector<2x6x9xf32>
    %97 = vector.shape_cast %8 : vector<1x9xf32> to vector<1x1x9xf32>
    %98 = vector.broadcast %97 : vector<1x1x9xf32> to vector<2x6x9xf32>
    %99 = arith.addf %96, %98 : vector<2x6x9xf32>
    %100 = vector.extract_strided_slice %99 {offsets = [0, 0, 0], sizes = [2, 6, 8], strides = [1, 1, 1]} : vector<2x6x9xf32> to vector<2x6x8xf32>
    %101 = vector.extract_strided_slice %99 {offsets = [0, 0, 8], sizes = [2, 6, 1], strides = [1, 1, 1]} : vector<2x6x9xf32> to vector<2x6x1xf32>
    %cst_27 = arith.constant dense<0xFF800000> : vector<2x1xf32>
    %102 = vector.multi_reduction <maximumf>, %101, %cst_27 [1] : vector<2x6x1xf32> to vector<2x1xf32>
    %103 = vector.shape_cast %102 : vector<2x1xf32> to vector<2x1x1xf32>
    %104 = vector.broadcast %103 : vector<2x1x1xf32> to vector<2x6x1xf32>
    %105 = arith.subf %101, %104 : vector<2x6x1xf32>
    %106 = math.exp %105 : vector<2x6x1xf32>
    %cst_28 = arith.constant dense<0.000000e+00> : vector<2x1xf32>
    %107 = vector.multi_reduction <add>, %106, %cst_28 [1] : vector<2x6x1xf32> to vector<2x1xf32>
    %108 = vector.broadcast %106 : vector<2x6x1xf32> to vector<2x6x8xf32>
    %109 = arith.mulf %108, %100 : vector<2x6x8xf32>
    %cst_29 = arith.constant dense<0.000000e+00> : vector<2x8xf32>
    %110 = vector.multi_reduction <add>, %109, %cst_29 [1] : vector<2x6x8xf32> to vector<2x8xf32>
    %cst_30 = arith.constant 6.000000e+00 : f32
    %111 = vector.broadcast %cst_30 : f32 to vector<2x1xf32>
    %112 = arith.mulf %107, %111 : vector<2x1xf32>
    %113 = tpu.reciprocal %112 {approx = true} : vector<2x1xf32> -> vector<2x1xf32>
    %114 = vector.broadcast %113 : vector<2x1xf32> to vector<2x8xf32>
    %115 = arith.mulf %110, %114 : vector<2x8xf32>
    %c0_31 = arith.constant 0 : index
    %c0_32 = arith.constant 0 : index
    %116 = vector.load %arg5[%c0_31, %c0_32] : memref<2x8xf32, #tpu.memory_space<vmem>>, vector<2x8xf32>
    tpu.vector_store %arg5[%c0_31, %c0_32], %115 {strides = array<i32>} : memref<2x8xf32, #tpu.memory_space<vmem>>, vector<2x8xf32>,
    return
  }
}

</mosaic_0001>

<bundles_post_ra>
// kernel: tpu_custom_call.1
= control target key start
LH: loop header
LB: loop body
LE: loop exit
PB: predicated region body
PF: predicated region fallthrough
CT: control target
= control target key end

     0   :  { %vm95_vm0 = vcmask 1044480   ;;  %vm37_vm1 = vcmask 1046528   ;;  %vm124_vm2 = vcmask 1043456   ;;  %vm66_vm3 = vcmask 1045504   ;;  %s1963_s24 = smov 12   ;;  %s1964_s25 = smov 4   ;;  %s2698_s0 = inlined_call_operand.vmem [shape: f32[2,24,4], index: 0, kind: input, shape index: {}]   ;;  %s2699_s1 = inlined_call_operand.vmem [shape: f32[20,32], index: 1, kind: input, shape index: {}]   ;;  %s2700_s2 = inlined_call_operand.vmem [shape: f32[160,32], index: 2, kind: input, shape index: {}]   ;;  %s2701_s3 = inlined_call_operand.vmem [shape: f32[32,9], index: 3, kind: input, shape index: {}]   ;;  %s2702_s4 = inlined_call_operand.vmem [shape: f32[8,32], index: 4, kind: input, shape index: {}]   ;;  %s2703_s5 = inlined_call_operand.hbm [shape: f32[2,8], index: 5, kind: output, shape index: {}]  }
   0x1   :  { %v2010_v0 = vld [vmem:[%s2698_s0] sm:$0xff]  ;;  %v2015_v1 = vld [vmem:[%s2698_s0 + $0x8] sm:$0xff]  ;;  %v2026_v8 = vld [vmem:[%s2698_s0 + $0x10] sm:$0xff] }
   0x2   :  { %v96_v2 = vrot.slane %v2010_v0, 3  ;;  %v97_v3 = vrot.slane %v2015_v1, 3  ;;  %v38_v4 = vrot.slane %v2010_v0, 1  ;;  %v39_v5 = vrot.slane %v2015_v1, 1 }
   0x3   :  { %v125_v6 = vrot.slane %v2010_v0, 4  ;;  %v126_v7 = vrot.slane %v2015_v1, 4  ;;  %v67_v11 = vrot.slane %v2010_v0, 2  ;;  %v68_v12 = vrot.slane %v2015_v1, 2 }
   0x4   :  { %v98_v9 = vsel %vm95_vm0, %v96_v2, %v97_v3  ;;  %v40_v10 = vsel %vm37_vm1, %v38_v4, %v39_v5  ;;  %v70_v15 = vrot.slane %v2026_v8, 2  ;;  %v41_v16 = vrot.slane %v2026_v8, 1 }
   0x5   :  { %106 = vrot.lane.b32.xlu1 %v98_v9, %s1963_s24  ;;  %48 = vrot.lane.b32.xlu0 %v40_v10, %s1964_s25  ;;  %v127_v13 = vsel %vm124_vm2, %v125_v6, %v126_v7  ;;  %v69_v14 = vsel %vm66_vm3, %v67_v11, %v68_v12 }
   0x6   :  { %10 = vsyncpa [#allocation3], 0  ;;  %s1965_s26 = smov 16   ;;  %s1966_s27 = smov 8   ;;  %v2043_v17 = vld [vmem:[%s2698_s0 + $0x18] sm:$0xff]  ;;  %v71_v18 = vsel %vm66_vm3, %v68_v12, %v70_v15  ;;  %v42_v19 = vsel %vm37_vm1, %v39_v5, %v41_v16  ;;  %v128_v20 = vrot.slane %v2026_v8, 4 }
   0x7   :  { %v99_v21 = vrot.slane %v2026_v8, 3  ;;  %v2052_v22 = vld [vmem:[%s2698_s0 + $0x20] sm:$0xff]  ;;  %v29_v24 = vld [vmem:[%s2699_s1 + $0x8] sm:$0xff]  ;;  %v43_v25 = vrot.slane %v2043_v17, 1  ;;  %v1967_v30 = vmov 0.0|0.0   ;;  %vm1968_vm4 = vmmov 0  }
   0x8   :  { %v28_v23 = vld [vmem:[%s2699_s1] sm:$0xff]  ;;  %v44_v26 = vrot.slane %v2052_v22, 1  ;;  %v129_v28 = vsel %vm124_vm2, %v126_v7, %v128_v20  ;;  %1861 = vmatprep.subr.bf16.mxu0 %v1967_v30  ;;  %1864 = vmatprep.subr.bf16.mxu1 %v1967_v30  ;;  %v1969_v31 = vmov 0.0   ;;  %v30_v32 = vld [vmem:[%s2699_s1 + $0x10] sm:$0xf]  ;;  %v72_v34 = vrot.slane %v2043_v17, 2 }
   0x9   :  { %135 = vrot.lane.b32.xlu1 %v127_v13, %s1965_s26  ;;  %77 = vrot.lane.b32.xlu0 %v69_v14, %s1966_s27  ;;  %v1862_v27 = vpack.c.bf16 %v29_v24, %v28_v23  ;;  %v100_v29 = vsel %vm95_vm0, %v97_v3, %v99_v21  ;;  %v73_v35 = vrot.slane %v2052_v22, 2  ;;  %v101_v37 = vrot.slane %v2043_v17, 3  ;;  %v2093_v42 = vld [vmem:[%s2698_s0 + $0x28] sm:$0xff]  ;;  %s1971_s10 = smov 32   ;;  %s1972_s11 = smov 64  }
   0xa   :  { %1835 = vmatprep.mubr.msk.f32.mxu0 %vm1968_vm4, %v1969_v31  ;;  %v45_v33 = vsel %vm37_vm1, %v43_v25, %v44_v26  ;;  %v102_v38 = vrot.slane %v2052_v22, 3  ;;  %v130_v40 = vrot.slane %v2043_v17, 4  ;;  %v131_v41 = vrot.slane %v2052_v22, 4  ;;  %s1973_s18 = smov 96  }
   0xb   :  { %1863 = vmatpush3.bf16.msra.mxu0 %v1862_v27  ;;  %v74_v36 = vsel %vm66_vm3, %v72_v34, %v73_v35  ;;  %v46_v44 = vrot.slane %v2093_v42, 1  ;;  %v75_v45 = vrot.slane %v2093_v42, 2  ;;  %v104_v48 = vrot.slane %v2093_v42, 3 }
   0xc   :  { %1833 = vmatprep.subr.mxu0 %v1969_v31  ;;  %v103_v39 = vsel %vm95_vm0, %v101_v37, %v102_v38  ;;  %v132_v43 = vsel %vm124_vm2, %v130_v40, %v131_v41  ;;  %v133_v49 = vrot.slane %v2093_v42, 4  ;;  %vm153_vm5 = vcmask 31744  }
   0xd   :  { %79 = vrot.lane.b32.xlu1 %v71_v18, %s1966_s27  ;;  %50 = vrot.lane.b32.xlu0 %v42_v19, %s1964_s25  ;;  %v47_v46 = vsel %vm37_vm1, %v44_v26, %v46_v44  ;;  %v76_v47 = vsel %vm66_vm3, %v73_v35, %v75_v45  ;;  %v105_v50 = vsel %vm95_vm0, %v102_v38, %v104_v48  ;;  %vm160_vm6 = vcmask 64512  }
   0xe   :  { %v134_v51 = vsel %vm124_vm2, %v131_v41, %v133_v49  ;;  %vm167_vm7 = vcmask 97280   ;;  %vm174_vm8 = vcmask 130048   ;;  %vm196_vm9 = vcmask 162816  }
   0xf   :  { %1834 = vmatpush3.msk.msra.mxu0 %vm124_vm2, %v30_v32  ;;  %vm358_vm10 = vcmask 261120   ;;  %vm362_vm11 = vcmask 257024   ;;  %vm597_vm12 = vcmask 254976   ;;  %vm770_vm13 = vcmask 1041409  }
  0x10   :  { %vm772_vm14 = vcmask 1042434   ;;  %vm774_vm15 = vcmask 1043459   ;;  %vm776_vm0 = vcmask 1044484   ;;  %vm778_vm1 = vcmask 1045509  }
  0x11   :  { %137 = vrot.lane.b32.xlu1 %v129_v28, %s1965_s26  ;;  %108 = vrot.lane.b32.xlu0 %v100_v29, %s1963_s24  ;;  %vm855_vm2 = vcmask 523264   ;;  %vm858_vm3 = vcmask 785408  }
  0x15   :  { %54 = vrot.lane.b32.xlu1 %v45_v33, %s1964_s25  ;;  %52 = vrot.lane.b32.xlu0 %v41_v16, %s1964_s25 }
  0x19   :  { %83 = vrot.lane.b32.xlu1 %v74_v36, %s1966_s27  ;;  %81 = vrot.lane.b32.xlu0 %v70_v15, %s1966_s27 }
  0x1d   :  { %112 = vrot.lane.b32.xlu1 %v103_v39, %s1963_s24  ;;  %110 = vrot.lane.b32.xlu0 %v99_v21, %s1963_s24 }
  0x21   :  { %141 = vrot.lane.b32.xlu1 %v132_v43, %s1965_s26  ;;  %139 = vrot.lane.b32.xlu0 %v128_v20, %s1965_s26 }
  0x25   :  { %56 = vrot.lane.b32.xlu0 %v47_v46, %s1964_s25  ;;  %85 = vrot.lane.b32.xlu1 %v76_v47, %s1966_s27 }
  0x29   :  { %114 = vrot.lane.b32.xlu0 %v105_v50, %s1963_s24  ;;  %143 = vrot.lane.b32.xlu1 %v134_v51, %s1965_s26 }
  0x2d   :  { %58 = vrot.lane.b32.xlu0 %v46_v44, %s1964_s25  ;;  %87 = vrot.lane.b32.xlu1 %v75_v45, %s1966_s27 }
  0x31   :  { %116 = vrot.lane.b32.xlu0 %v104_v48, %s1963_s24  ;;  %145 = vrot.lane.b32.xlu1 %v133_v49, %s1965_s26  ;;  %v315_v48 = vlaneseq }
  0x33   :  { %v2159_v49 = vshrl.u32 %v315_v48, 7 }
  0x77   :  { %v107_v52 = vpop.permute.xlu1 %106  ;;  %v49_v53 = vpop.permute.xlu0 %48 }
  0x78   :  { %v154_v54 = vsel %vm153_vm5, %v2010_v0, %v49_v53 }
  0x7b   :  { %v136_v55 = vpop.permute.xlu1 %135  ;;  %v78_v56 = vpop.permute.xlu0 %77 }
  0x7c   :  { %v161_v57 = vsel %vm160_vm6, %v154_v54, %v78_v56 }
  0x7d   :  { %v168_v58 = vsel %vm167_vm7, %v161_v57, %v107_v52 }
  0x7e   :  { %v175_v59 = vsel %vm174_vm8, %v168_v58, %v136_v55 }
  0x7f   :  { %v187_v60 = vcombine.high %v175_v59, %v175_v59  ;;  %v80_v61 = vpop.permute.xlu1 %79  ;;  %v51_v62 = vpop.permute.xlu0 %50 }
  0x80   :  { %v155_v63 = vsel %vm153_vm5, %v2015_v1, %v51_v62 }
  0x81   :  { %v191_v2 = vcombine.low %v175_v59, %v187_v60  ;;  %v162_v0 = vsel %vm160_vm6, %v155_v63, %v80_v61  ;;  %v738_v63 = vld [vmem:[%s2700_s2] sm:$0xff] }
  0x83   :  { %v138_v3 = vpop.permute.xlu1 %137  ;;  %1836 = vmatmul.mubr.msk.f32.vlgmr.msra.gmra.mrb[0].mxu0 %vm196_vm9, %v191_v2  ;;  %v109_v4 = vpop.permute.xlu0 %108  ;;  %v739_v2 = vld [vmem:[%s2700_s2 + $0x8] sm:$0xff] }
  0x84   :  { %v169_v5 = vsel %vm167_vm7, %v162_v0, %v109_v4  ;;  %1838 = vmatprep.mubr.msk.f32.mxu0 %vm1968_vm4, %v1969_v31 }
  0x85   :  { %v176_v6 = vsel %vm174_vm8, %v169_v5, %v138_v3  ;;  %v740_v3 = vld [vmem:[%s2700_s2 + $0x10] sm:$0xff] }
  0x86   :  { %v188_v7 = vcombine.high %v176_v6, %v176_v6 }
  0x87   :  { %v55_v9 = vpop.permute.xlu1 %54  ;;  %v53_v10 = vpop.permute.xlu0 %52 }
  0x88   :  { %v192_v11 = vcombine.low %v176_v6, %v188_v7  ;;  %v157_v15 = vsel %vm153_vm5, %v2043_v17, %v55_v9  ;;  %v156_v16 = vsel %vm153_vm5, %v2026_v8, %v53_v10  ;;  %v1865_v6 = vpack.c.bf16 %v739_v2, %v738_v63  ;;  %v741_v7 = vld [vmem:[%s2700_s2 + $0x18] sm:$0xff] }
  0x8a   :  { %1839 = vmatmul.mubr.msk.f32.gmra.mrb[2].mxu0 %vm196_vm9, %v192_v11  ;;  %1866 = vmatpush1.bf16.msra.mxu1 %v1865_v6 }
  0x8b   :  { %v84_v1 = vpop.permute.xlu1 %83  ;;  %v82_v12 = vpop.permute.xlu0 %81  ;;  %1841 = vmatprep.mubr.msk.f32.mxu0 %vm1968_vm4, %v1969_v31  ;;  %1867 = vmatprep.subr.bf16.mxu1 %v1967_v30 }
  0x8c   :  { %v164_v18 = vsel %vm160_vm6, %v157_v15, %v84_v1  ;;  %v163_v19 = vsel %vm160_vm6, %v156_v16, %v82_v12  ;;  %v1868_v1 = vpack.c.bf16 %v741_v7, %v740_v3  ;;  %v742_v12 = vld [vmem:[%s2700_s2 + $0x20] sm:$0xff] }
  0x8e   :  { %1869 = vmatpush1.bf16.msra.mxu1 %v1868_v1 }
  0x8f   :  { %v113_v13 = vpop.permute.xlu1 %112  ;;  %v111_v14 = vpop.permute.xlu0 %110  ;;  %1870 = vmatprep.subr.bf16.mxu1 %v1967_v30 }
  0x90   :  { %v171_v20 = vsel %vm167_vm7, %v164_v18, %v113_v13  ;;  %v170_v21 = vsel %vm167_vm7, %v163_v19, %v111_v14  ;;  %v743_v13 = vld [vmem:[%s2700_s2 + $0x28] sm:$0xff] }
  0x93   :  { %v142_v23 = vpop.permute.xlu1 %141  ;;  %v140_v24 = vpop.permute.xlu0 %139 }
  0x94   :  { %v178_v25 = vsel %vm174_vm8, %v171_v20, %v142_v23  ;;  %v177_v26 = vsel %vm174_vm8, %v170_v21, %v140_v24  ;;  %v1871_v23 = vpack.c.bf16 %v743_v13, %v742_v12 }
  0x95   :  { %v193_v27 = vcombine.low %v177_v26, %v178_v25  ;;  %v189_v34 = vcombine.high %v178_v25, %v178_v25  ;;  %v744_v25 = vld [vmem:[%s2700_s2 + $0x30] sm:$0xff]  ;;  %v745_v26 = vld [vmem:[%s2700_s2 + $0x38] sm:$0xff] }
  0x96   :  { %1872 = vmatpush1.bf16.msra.mxu1 %v1871_v23 }
  0x97   :  { %1842 = vmatmul.mubr.msk.f32.gmra.mrb[4].mxu0 %vm196_vm9, %v193_v27  ;;  %v57_v17 = vpop.permute.xlu0 %56  ;;  %v86_v28 = vpop.permute.xlu1 %85  ;;  %1873 = vmatprep.subr.bf16.mxu1 %v1967_v30 }
  0x98   :  { %v158_v8 = vsel %vm153_vm5, %v2052_v22, %v57_v17  ;;  %1844 = vmatprep.mubr.msk.f32.mxu0 %vm1968_vm4, %v1969_v31 }
  0x99   :  { %v165_v29 = vsel %vm160_vm6, %v158_v8, %v86_v28 }
  0x9b   :  { %v115_v32 = vpop.permute.xlu0 %114  ;;  %v144_v33 = vpop.permute.xlu1 %143 }
  0x9c   :  { %v172_v35 = vsel %vm167_vm7, %v165_v29, %v115_v32  ;;  %v1874_v29 = vpack.c.bf16 %v745_v26, %v744_v25 }
  0x9d   :  { %v179_v36 = vsel %vm174_vm8, %v172_v35, %v144_v33  ;;  %v747_v35 = vld [vmem:[%s2700_s2 + $0x48] sm:$0xff] }
  0x9e   :  { %v194_v37 = vcombine.low %v189_v34, %v179_v36  ;;  %v190_v44 = vcombine.high %v179_v36, %v179_v36  ;;  %v746_v34 = vld [vmem:[%s2700_s2 + $0x40] sm:$0xff]  ;;  %1875 = vmatpush1.bf16.msra.mxu1 %v1874_v29 }
  0x9f   :  { %v59_v38 = vpop.permute.xlu0 %58  ;;  %v88_v39 = vpop.permute.xlu1 %87  ;;  %1876 = vmatprep.subr.bf16.mxu1 %v1967_v30 }
  0xa0   :  { %v159_v40 = vsel %vm153_vm5, %v2093_v42, %v59_v38  ;;  %1845 = vmatmul.mubr.msk.f32.gmra.mrb[6].mxu0 %vm196_vm9, %v194_v37  ;;  %v317_v42 = vsub.s32 0, %v2159_v49  ;;  %v1877_v38 = vpack.c.bf16 %v747_v35, %v746_v34  ;;  %vm1515_vm5 = vcmask 70720  }
  0xa1   :  { %1847 = vmatprep.mubr.msk.f32.mxu0 %vm1968_vm4, %v1969_v31  ;;  %v166_v22 = vsel %vm160_vm6, %v159_v40, %v88_v39  ;;  %v2165_v31 = vld [vmem:[%s2702_s4] sm:$0xff]  ;;  %vm1114_vm4 = vcmask 259072   ;;  %vm1754_vm6 = vcmask 62464  }
  0xa2   :  { %v2168_v50 = vrot.slane %v2165_v31, %v317_v42  ;;  %1878 = vmatpush1.bf16.msra.mxu1 %v1877_v38 }
  0xa3   :  { %v117_v41 = vpop.permute.xlu0 %116  ;;  %v146_v43 = vpop.permute.xlu1 %145  ;;  %1879 = vmatprep.subr.bf16.mxu1 %v1967_v30 }
  0xa4   :  { %v173_v45 = vsel %vm167_vm7, %v166_v22, %v117_v41  ;;  %v2172_v51 = vcombine.high %v2168_v50, %v2168_v50  ;;  %vm1789_vm7 = vcmask 58368  }
  0xa5   :  { %v180_v46 = vsel %vm174_vm8, %v173_v45, %v146_v43 }
  0xa6   :  { %v195_v47 = vcombine.low %v190_v44, %v180_v46 }
  0xa8   :  { %1848 = vmatmul.mubr.msk.f32.gmra.mrb[8].mxu0 %vm196_vm9, %v195_v47 }
 0x156   :  { %v276_v52 = vpop.f32.mrb[0].mxu0 }
 0x157   :  { %v305_v53 = vcombine.high %v276_v52, %v276_v52  ;;  %v1837_v54 = vpop.f32.mrb[1].mxu0  ;;  %v322_v56 = vadd.f32 %v2168_v50, %v276_v52 }
 0x159   :  { %v323_v55 = vadd.f32 %v2172_v51, %v305_v53  ;;  %v2178_v59 = vmax.f32 %v322_v56, 0.0 }
 0x15b   :  { %v2176_v57 = vmax.f32 %v323_v55, 0.0  ;;  %v377_v10 = vmul.f32 %v2178_v59, %v2178_v59 }
 0x15d   :  { %v281_v58 = vpop.f32.mrb[2].mxu0  ;;  %v378_v0 = vmul.f32 %v2176_v57, %v2176_v57  ;;  %v350_v9 = vcombine.low %v2178_v59, %v2176_v57 }
 0x15e   :  { %v306_v60 = vcombine.high %v281_v58, %v281_v58  ;;  %v324_v61 = vadd.f32 %v2168_v50, %v281_v58  ;;  %v1840_v62 = vpop.f32.mrb[3].mxu0 }
 0x15f   :  { %v395_v14 = vcombine.low %v377_v10, %v378_v0  ;;  %v359_v19 = vsel %vm358_vm10, %v350_v9, 0.0 }
 0x160   :  { %v325_v4 = vadd.f32 %v2172_v51, %v306_v60  ;;  %v2193_v5 = vmax.f32 %v324_v61, 0.0 }
 0x161   :  { %v403_v27 = vsel %vm358_vm10, %v395_v14, 0.0 }
 0x162   :  { %v2202_v11 = vmax.f32 %v325_v4, 0.0  ;;  %v379_v16 = vmul.f32 %v2193_v5, %v2193_v5 }
 0x164   :  { %v351_v15 = vcombine.low %v2193_v5, %v2202_v11  ;;  %v380_v18 = vmul.f32 %v2202_v11, %v2202_v11 }
 0x166   :  { %v360_v20 = vsel %vm358_vm10, %v351_v15, 0.0  ;;  %v396_v21 = vcombine.low %v379_v16, %v380_v18 }
 0x167   :  { %v361_v24 = vadd.f32 %v360_v20, %v359_v19 }
 0x168   :  { %v404_v17 = vsel %vm358_vm10, %v396_v21, 0.0 }
 0x169   :  { %v405_v28 = vadd.f32 %v404_v17, %v403_v27 }
 0x16a   :  { %v286_v8 = vpop.f32.mrb[4].mxu0 }
 0x16b   :  { %v326_v32 = vadd.f32 %v2168_v50, %v286_v8  ;;  %v1843_v33 = vpop.f32.mrb[5].mxu0  ;;  %v307_v36 = vcombine.high %v286_v8, %v286_v8 }
 0x16d   :  { %v2236_v37 = vmax.f32 %v326_v32, 0.0  ;;  %v327_v22 = vadd.f32 %v2168_v50, %v307_v36 }
 0x16f   :  { %v363_v39 = vsel %vm362_vm11, %v2236_v37, 0.0  ;;  %v381_v40 = vmul.f32 %v2236_v37, %v2236_v37  ;;  %v2246_v46 = vmax.f32 %v327_v22, 0.0 }
 0x170   :  { %v364_v41 = vadd.f32 %v363_v39, %v361_v24 }
 0x171   :  { %v406_v43 = vsel %vm362_vm11, %v381_v40, 0.0  ;;  %v382_v53 = vmul.f32 %v2246_v46, %v2246_v46 }
 0x172   :  { %v407_v44 = vadd.f32 %v406_v43, %v405_v28 }
 0x173   :  { %v291_v45 = vpop.f32.mrb[6].mxu0 }
 0x174   :  { %v308_v47 = vcombine.high %v291_v45, %v291_v45  ;;  %v328_v48 = vadd.f32 %v2172_v51, %v291_v45  ;;  %v1846_v42 = vpop.f32.mrb[7].mxu0 }
 0x176   :  { %v2249_v52 = vmax.f32 %v328_v48, 0.0  ;;  %v329_v54 = vadd.f32 %v2168_v50, %v308_v47 }
 0x178   :  { %v352_v55 = vcombine.low %v2246_v46, %v2249_v52  ;;  %v383_v56 = vmul.f32 %v2249_v52, %v2249_v52  ;;  %v2259_v63 = vmax.f32 %v329_v54, 0.0 }
 0x17a   :  { %v365_v58 = vsel %vm358_vm10, %v352_v55, 0.0  ;;  %v397_v60 = vcombine.low %v382_v53, %v383_v56  ;;  %v384_v10 = vmul.f32 %v2259_v63, %v2259_v63 }
 0x17b   :  { %v366_v61 = vadd.f32 %v365_v58, %v364_v41  ;;  %v296_v62 = vpop.f32.mrb[8].mxu0 }
 0x17c   :  { %v408_v2 = vsel %vm358_vm10, %v397_v60, 0.0  ;;  %v309_v3 = vcombine.high %v296_v62, %v296_v62  ;;  %v330_v0 = vadd.f32 %v2172_v51, %v296_v62  ;;  %v1849_v4 = vpop.f32.mrb[9].mxu0 }
 0x17d   :  { %v409_v6 = vadd.f32 %v408_v2, %v407_v44 }
 0x17e   :  { %v331_v7 = vadd.f32 %v2168_v50, %v309_v3  ;;  %v2264_v9 = vmax.f32 %v330_v0, 0.0 }
 0x180   :  { %v341_v1 = vmax.f32 %v331_v7, 0.0  ;;  %v353_v12 = vcombine.low %v2259_v63, %v2264_v9  ;;  %v385_v13 = vmul.f32 %v2264_v9, %v2264_v9 }
 0x182   :  { %v367_v14 = vsel %vm358_vm10, %v353_v12, 0.0  ;;  %v386_v15 = vmul.f32 %v341_v1, %v341_v1  ;;  %v398_v51 = vcombine.low %v384_v10, %v385_v13  ;;  %v369_v18 = vsel %vm362_vm11, %v341_v1, 0.0 }
 0x183   :  { %v368_v16 = vadd.f32 %v367_v14, %v366_v61 }
 0x184   :  { %v410_v50 = vsel %vm358_vm10, %v398_v51, 0.0  ;;  %v412_v21 = vsel %vm362_vm11, %v386_v15, 0.0 }
 0x185   :  { %v370_v19 = vadd.f32 %v369_v18, %v368_v16  ;;  %v411_v20 = vadd.f32 %v410_v50, %v409_v6 }
 0x187   :  { %v371_v23 = vrot.slane %v370_v19, 4  ;;  %v413_v24 = vadd.f32 %v412_v21, %v411_v20 }
 0x189   :  { %v372_v25 = vadd.f32 %v371_v23, %v370_v19  ;;  %v414_v26 = vrot.slane %v413_v24, 4 }
 0x18b   :  { %v373_v27 = vrot.slane %v372_v25, 2  ;;  %v415_v17 = vadd.f32 %v414_v26, %v413_v24 }
 0x18d   :  { %v374_v28 = vadd.f32 %v373_v27, %v372_v25  ;;  %v416_v8 = vrot.slane %v415_v17, 2 }
 0x18f   :  { %v375_v29 = vrot.slane %v374_v28, 1  ;;  %v417_v32 = vadd.f32 %v416_v8, %v415_v17 }
 0x191   :  { %v376_v33 = vadd.f32 %v375_v29, %v374_v28  ;;  %v418_v34 = vrot.slane %v417_v32, 1 }
 0x193   :  { %v419_v35 = vadd.f32 %v418_v34, %v417_v32  ;;  %v420_v36 = vmul.f32 0.025, %v376_v33 }
 0x195   :  { %v421_v38 = vmul.f32 0.025, %v419_v35  ;;  %v422_v39 = vmul.f32 %v420_v36, %v420_v36  ;;  %v426_v40 = vcombine.high %v420_v36, %v420_v36  ;;  %v437_v22 = vsub.f32 %v341_v1, %v420_v36 }
 0x196   :  { %v428_v41 = vsub.f32 %v2178_v59, %v420_v36  ;;  %v430_v43 = vsub.f32 %v2193_v5, %v420_v36  ;;  %v433_v44 = vsub.f32 %v2246_v46, %v420_v36  ;;  %v435_v45 = vsub.f32 %v2259_v63, %v420_v36 }
 0x197   :  { %v423_v47 = vsub.f32 %v421_v38, %v422_v39  ;;  %v429_v48 = vsub.f32 %v2176_v57, %v426_v40  ;;  %v431_v42 = vsub.f32 %v2202_v11, %v426_v40  ;;  %v434_v53 = vsub.f32 %v2249_v52, %v426_v40 }
 0x198   :  { %v436_v54 = vsub.f32 %v2264_v9, %v426_v40  ;;  %v432_v55 = vsub.f32 %v2236_v37, %v420_v36  ;;  %v455_v59 = vsub.s32 1, %v2159_v49  ;;  %v472_v5 = vsub.s32 2, %v2159_v49 }
 0x199   :  { %v424_v56 = vmax.f32 %v423_v47, 0.0  ;;  %v1970_v46 = vmov 1983009808  }
 0x19a   :  { %v498_v60 = vunpack.c.l.s4 %v1970_v46  ;;  %v2288_v61 = vrot.slane %v2165_v31, %v455_v59  ;;  %v2291_v57 = vrot.slane %v2165_v31, %v472_v5 }
 0x19b   :  { %v438_v58 = vadd.f32 1e-05, %v424_v56 }
 0x19c   :  { %v499_v11 = vunpack.c.0.s8 %v498_v60  ;;  %v458_v37 = vcombine.high %v2288_v61, %v2288_v61  ;;  %v475_v62 = vcombine.high %v2291_v57, %v2291_v57 }
 0x19d   :  { %1918 = vrsqrt.f32 %v438_v58 }
 0x19e   :  { %v2298_v63 = vsub.s32 %v499_v11, %v2159_v49 }
 0x1a7   :  { %v1919_v52 = vpop.eup %1918 }
 0x1a8   :  { %v441_v2 = vcombine.high %v1919_v52, %v1919_v52  ;;  %v452_v3 = vmul.f32 %v1919_v52, %v437_v22  ;;  %v443_v0 = vmul.f32 %v1919_v52, %v428_v41  ;;  %v445_v4 = vmul.f32 %v1919_v52, %v430_v43 }
 0x1a9   :  { %v448_v6 = vmul.f32 %v1919_v52, %v433_v44  ;;  %v450_v7 = vmul.f32 %v1919_v52, %v435_v45  ;;  %v2300_v9 = vmul.f32 %v1919_v52, %v432_v55 }
 0x1aa   :  { %v444_v10 = vmul.f32 %v441_v2, %v429_v48  ;;  %v449_v1 = vmul.f32 %v441_v2, %v434_v53  ;;  %v451_v12 = vmul.f32 %v441_v2, %v436_v54  ;;  %v469_v13 = vmul.f32 %v2288_v61, %v452_v3 }
 0x1ab   :  { %v446_v14 = vmul.f32 %v441_v2, %v431_v42  ;;  %v460_v15 = vmul.f32 %v2288_v61, %v443_v0  ;;  %v462_v51 = vmul.f32 %v2288_v61, %v445_v4  ;;  %v465_v16 = vmul.f32 %v2288_v61, %v448_v6 }
 0x1ac   :  { %v468_v18 = vmul.f32 %v458_v37, %v451_v12  ;;  %v2307_v50 = vadd.f32 %v2291_v57, %v469_v13  ;;  %v461_v19 = vmul.f32 %v458_v37, %v444_v10  ;;  %v466_v20 = vmul.f32 %v458_v37, %v449_v1 }
 0x1ad   :  { %v463_v21 = vmul.f32 %v458_v37, %v446_v14  ;;  %v477_v23 = vadd.f32 %v2291_v57, %v460_v15  ;;  %v479_v24 = vadd.f32 %v2291_v57, %v462_v51  ;;  %v467_v25 = vmul.f32 %v2288_v61, %v450_v7 }
 0x1ae   :  { %v485_v26 = vadd.f32 %v475_v62, %v468_v18  ;;  %v478_v27 = vadd.f32 %v475_v62, %v461_v19  ;;  %v482_v17 = vadd.f32 %v2291_v57, %v465_v16  ;;  %v483_v28 = vadd.f32 %v475_v62, %v466_v20 }
 0x1af   :  { %v480_v8 = vadd.f32 %v475_v62, %v463_v21  ;;  %v2314_v29 = vrot.slane %v477_v23, %v2298_v63  ;;  %v519_v32 = vrot.slane %v479_v24, %v2298_v63  ;;  %v484_v33 = vadd.f32 %v2291_v57, %v467_v25 }
 0x1b0   :  { %v2319_v34 = vrot.slane %v485_v26, %v2298_v63  ;;  %v511_v35 = vrot.slane %v478_v27, %v2298_v63  ;;  %v2323_v36 = vrot.slane %v482_v17, %v2298_v63  ;;  %v2326_v38 = vrot.slane %v483_v28, %v2298_v63 }
 0x1b1   :  { %v504_v39 = vcombine.high %v2314_v29, %v2314_v29  ;;  %v520_v40 = vcombine.high %v519_v32, %v519_v32  ;;  %v527_v22 = vrot.slane %v480_v8, %v2298_v63  ;;  %v626_v41 = vsel %vm597_vm12, %v519_v32, -inf }
 0x1b2   :  { %v512_v43 = vcombine.high %v511_v35, %v511_v35  ;;  %v612_v44 = vsel %vm597_vm12, %v511_v35, -inf  ;;  %v627_v45 = vrot.slane %v626_v41, 4  ;;  %v544_v47 = vcombine.high %v2323_v36, %v2323_v36 }
 0x1b3   :  { %v605_v48 = vsel %vm597_vm12, %v504_v39, -inf  ;;  %v613_v42 = vrot.slane %v612_v44, 4  ;;  %v633_v53 = vsel %vm597_vm12, %v520_v40, -inf  ;;  %v640_v54 = vsel %vm597_vm12, %v527_v22, -inf }
 0x1b4   :  { %v606_v55 = vrot.slane %v605_v48, 4  ;;  %v619_v56 = vsel %vm597_vm12, %v512_v43, -inf  ;;  %v628_v58 = vmax.f32 %v626_v41, %v627_v45  ;;  %v634_v59 = vrot.slane %v633_v53, 4 }
 0x1b5   :  { %v614_v5 = vmax.f32 %v612_v44, %v613_v42  ;;  %v620_v46 = vrot.slane %v619_v56, 4  ;;  %v641_v60 = vrot.slane %v640_v54, 4  ;;  %v528_v11 = vcombine.high %v527_v22, %v527_v22 }
 0x1b6   :  { %v607_v52 = vmax.f32 %v605_v48, %v606_v55  ;;  %v629_v37 = vrot.slane %v628_v58, 2  ;;  %v635_v62 = vmax.f32 %v633_v53, %v634_v59  ;;  %v552_v2 = vcombine.high %v2326_v38, %v2326_v38 }
 0x1b7   :  { %v615_v3 = vrot.slane %v614_v5, 2  ;;  %v621_v0 = vmax.f32 %v619_v56, %v620_v46  ;;  %v642_v4 = vmax.f32 %v640_v54, %v641_v60  ;;  %v647_v6 = vsel %vm597_vm12, %v528_v11, -inf }
 0x1b8   :  { %v608_v7 = vrot.slane %v607_v52, 2  ;;  %v630_v10 = vmax.f32 %v628_v58, %v629_v37  ;;  %v636_v1 = vrot.slane %v635_v62, 2  ;;  %v648_v12 = vrot.slane %v647_v6, 4 }
 0x1b9   :  { %v616_v13 = vmax.f32 %v614_v5, %v615_v3  ;;  %v622_v14 = vrot.slane %v621_v0, 2  ;;  %v643_v15 = vrot.slane %v642_v4, 2  ;;  %v559_v51 = vrot.slane %v484_v33, %v2298_v63 }
 0x1ba   :  { %v609_v16 = vmax.f32 %v607_v52, %v608_v7  ;;  %v631_v18 = vrot.slane %v630_v10, 1  ;;  %v637_v19 = vmax.f32 %v635_v62, %v636_v1  ;;  %v649_v20 = vmax.f32 %v647_v6, %v648_v12 }
 0x1bb   :  { %v617_v21 = vrot.slane %v616_v13, 1  ;;  %v623_v23 = vmax.f32 %v621_v0, %v622_v14  ;;  %v644_v24 = vmax.f32 %v642_v4, %v643_v15  ;;  %v560_v25 = vcombine.high %v559_v51, %v559_v51 }
 0x1bc   :  { %v610_v26 = vrot.slane %v609_v16, 1  ;;  %v2343_v27 = vmax.f32 %v630_v10, %v631_v18  ;;  %v638_v17 = vrot.slane %v637_v19, 1  ;;  %v650_v28 = vrot.slane %v649_v20, 2 }
 0x1bd   :  { %v2345_v8 = vmax.f32 %v616_v13, %v617_v21  ;;  %v624_v32 = vrot.slane %v623_v23, 1  ;;  %v645_v35 = vrot.slane %v644_v24, 1  ;;  %v675_v39 = vsel %vm597_vm12, %v544_v47, -inf }
 0x1be   :  { %v2348_v33 = vmax.f32 %v609_v16, %v610_v26  ;;  %v2350_v40 = vmax.f32 %v637_v19, %v638_v17  ;;  %v651_v22 = vmax.f32 %v649_v20, %v650_v28  ;;  %v676_v41 = vrot.slane %v675_v39, 4 }
 0x1bf   :  { %v2352_v43 = vmax.f32 %v623_v23, %v624_v32  ;;  %v2354_v44 = vmax.f32 %v644_v24, %v645_v35  ;;  %v682_v45 = vsel %vm597_vm12, %v2326_v38, -inf  ;;  %v689_v48 = vsel %vm597_vm12, %v552_v2, -inf }
 0x1c0   :  { %v789_v42 = vsel %vm770_vm13, %v2345_v8, %v2348_v33  ;;  %v652_v47 = vrot.slane %v651_v22, 1  ;;  %v677_v53 = vmax.f32 %v675_v39, %v676_v41  ;;  %v683_v54 = vrot.slane %v682_v45, 4 }
 0x1c1   :  { %v790_v55 = vsel %vm772_vm14, %v2352_v43, %v789_v42  ;;  %v807_v56 = vsel %vm770_vm13, %v2352_v43, %v2345_v8  ;;  %v690_v58 = vrot.slane %v689_v48, 4  ;;  %v696_v59 = vsel %vm597_vm12, %v559_v51, -inf }
 0x1c2   :  { %v791_v38 = vsel %vm774_vm15, %v2343_v27, %v790_v55  ;;  %v2370_v5 = vmax.f32 %v651_v22, %v652_v47  ;;  %v808_v46 = vsel %vm772_vm14, %v2343_v27, %v807_v56  ;;  %v678_v60 = vrot.slane %v677_v53, 2 }
 0x1c3   :  { %v792_v11 = vsel %vm776_vm0, %v2350_v40, %v791_v38  ;;  %v809_v52 = vsel %vm774_vm15, %v2350_v40, %v808_v46  ;;  %v684_v37 = vmax.f32 %v682_v45, %v683_v54  ;;  %v691_v62 = vmax.f32 %v689_v48, %v690_v58 }
 0x1c4   :  { %v793_v2 = vsel %vm778_vm1, %v2354_v44, %v792_v11  ;;  %v810_v3 = vsel %vm776_vm0, %v2354_v44, %v809_v52  ;;  %v679_v0 = vmax.f32 %v677_v53, %v678_v60  ;;  %v697_v4 = vrot.slane %v696_v59, 4 }
 0x1c5   :  { %799 = vrot.lane.b32.xlu0 %v793_v2, %s1971_s10  ;;  %v811_v6 = vsel %vm778_vm1, %v2370_v5, %v810_v3  ;;  %v685_v7 = vrot.slane %v684_v37, 2  ;;  %v692_v10 = vrot.slane %v691_v62, 2  ;;  %v703_v1 = vsel %vm597_vm12, %v560_v25, -inf }
 0x1c6   :  { %817 = vrot.lane.b32.xlu1 %v811_v6, %s1972_s11  ;;  %v680_v12 = vrot.slane %v679_v0, 1  ;;  %v698_v13 = vmax.f32 %v696_v59, %v697_v4  ;;  %v704_v14 = vrot.slane %v703_v1, 4  ;;  %v710_v15 = vsel %vm597_vm12, %v2319_v34, -inf }
 0x1c7   :  { %v686_v51 = vmax.f32 %v684_v37, %v685_v7  ;;  %v693_v16 = vmax.f32 %v691_v62, %v692_v10  ;;  %v711_v18 = vrot.slane %v710_v15, 4  ;;  %v464_v19 = vmul.f32 %v2288_v61, %v2300_v9 }
 0x1c8   :  { %v2391_v20 = vmax.f32 %v679_v0, %v680_v12  ;;  %v699_v21 = vrot.slane %v698_v13, 2  ;;  %v705_v23 = vmax.f32 %v703_v1, %v704_v14  ;;  %v825_v24 = vsel %vm770_vm13, %v2343_v27, %v2352_v43  ;;  %v749_v14 = vld [vmem:[%s2700_s2 + $0x58] sm:$0xff] }
 0x1c9   :  { %v687_v25 = vrot.slane %v686_v51, 1  ;;  %v694_v26 = vrot.slane %v693_v16, 1  ;;  %v712_v17 = vmax.f32 %v710_v15, %v711_v18  ;;  %v481_v28 = vadd.f32 %v2291_v57, %v464_v19 }
 0x1ca   :  { %v700_v32 = vmax.f32 %v698_v13, %v699_v21  ;;  %v706_v35 = vrot.slane %v705_v23, 2  ;;  %v826_v39 = vsel %vm772_vm14, %v2350_v40, %v825_v24  ;;  %v568_v61 = vcombine.high %v2319_v34, %v2319_v34  ;;  %v748_v13 = vld [vmem:[%s2700_s2 + $0x50] sm:$0xff] }
 0x1cb   :  { %v2401_v9 = vmax.f32 %v686_v51, %v687_v25  ;;  %v2403_v22 = vmax.f32 %v693_v16, %v694_v26  ;;  %v713_v41 = vrot.slane %v712_v17, 2  ;;  %v535_v45 = vrot.slane %v481_v28, %v2298_v63 }
 0x1cc   :  { %v701_v48 = vrot.slane %v700_v32, 1  ;;  %v707_v42 = vmax.f32 %v705_v23, %v706_v35  ;;  %v827_v57 = vsel %vm774_vm15, %v2354_v44, %v826_v39  ;;  %v717_v47 = vsel %vm597_vm12, %v568_v61, -inf }
 0x1cd   :  { %v714_v53 = vmax.f32 %v712_v17, %v713_v41  ;;  %v794_v54 = vsel %vm770_vm13, %v2401_v9, %v2391_v20  ;;  %v654_v34 = vsel %vm597_vm12, %v535_v45, -inf  ;;  %v828_v55 = vsel %vm776_vm0, %v2370_v5, %v827_v57 }
 0x1ce   :  { %v2415_v56 = vmax.f32 %v700_v32, %v701_v48  ;;  %v708_v58 = vrot.slane %v707_v42, 1  ;;  %v795_v59 = vsel %vm772_vm14, %v2403_v22, %v794_v54  ;;  %v655_v38 = vrot.slane %v654_v34, 4 }
 0x1cf   :  { %v715_v46 = vrot.slane %v714_v53, 1  ;;  %v718_v60 = vrot.slane %v717_v47, 4  ;;  %v812_v11 = vsel %vm770_vm13, %v2403_v22, %v2401_v9  ;;  %v2424_v52 = vrot.slane %v2307_v50, %v2298_v63 }
 0x1d0   :  { %v2426_v37 = vmax.f32 %v707_v42, %v708_v58  ;;  %v796_v62 = vsel %vm774_vm15, %v2415_v56, %v795_v59  ;;  %v656_v2 = vmax.f32 %v654_v34, %v655_v38  ;;  %v813_v3 = vsel %vm772_vm14, %v2415_v56, %v812_v11  ;;  %v750_v58 = vld [vmem:[%s2700_s2 + $0x60] sm:$0xff]  ;;  %v751_v59 = vld [vmem:[%s2700_s2 + $0x68] sm:$0xff] }
 0x1d1   :  { %v2432_v0 = vmax.f32 %v714_v53, %v715_v46  ;;  %v719_v4 = vmax.f32 %v717_v47, %v718_v60  ;;  %v724_v6 = vsel %vm597_vm12, %v2424_v52, -inf  ;;  %v830_v50 = vsel %vm770_vm13, %v2415_v56, %v2403_v22 }
 0x1d2   :  { %v797_v7 = vsel %vm776_vm0, %v2426_v37, %v796_v62  ;;  %v657_v10 = vrot.slane %v656_v2, 2  ;;  %v814_v1 = vsel %vm774_vm15, %v2426_v37, %v813_v3  ;;  %v725_v12 = vrot.slane %v724_v6, 4  ;;  %v752_v3 = vld [vmem:[%s2700_s2 + $0x70] sm:$0xff] }
 0x1d3   :  { %v798_v15 = vsel %vm778_vm1, %v2432_v0, %v797_v7  ;;  %v720_v51 = vrot.slane %v719_v4, 2  ;;  %v815_v16 = vsel %vm776_vm0, %v2432_v0, %v814_v1  ;;  %v831_v18 = vsel %vm772_vm14, %v2426_v37, %v830_v50 }
 0x1d4   :  { %801 = vrot.lane.b32.xlu0 %v798_v15, %s1971_s10  ;;  %v658_v19 = vmax.f32 %v656_v2, %v657_v10  ;;  %v726_v21 = vmax.f32 %v724_v6, %v725_v12  ;;  %v832_v23 = vsel %vm774_vm15, %v2432_v0, %v831_v18  ;;  %v598_v24 = vsel %vm597_vm12, %v2314_v29, -inf }
 0x1d5   :  { %v721_v25 = vmax.f32 %v719_v4, %v720_v51  ;;  %v599_v26 = vrot.slane %v598_v24, 4  ;;  %v1880_v17 = vpack.c.bf16 %v749_v14, %v748_v13  ;;  %v668_v35 = vsel %vm597_vm12, %v2323_v36, -inf }
 0x1d6   :  { %v659_v28 = vrot.slane %v658_v19, 1  ;;  %v727_v32 = vrot.slane %v726_v21, 2  ;;  %v536_v39 = vcombine.high %v535_v45, %v535_v45  ;;  %v669_v48 = vrot.slane %v668_v35, 4 }
 0x1d7   :  { %v722_v61 = vrot.slane %v721_v25, 1  ;;  %v600_v41 = vmax.f32 %v598_v24, %v599_v26  ;;  %1881 = vmatpush1.bf16.msra.mxu1 %v1880_v17  ;;  %v843_v42 = vsel %vm770_vm13, %v2350_v40, %v2343_v27  ;;  %v1883_v50 = vpack.c.bf16 %v751_v59, %v750_v58 }
 0x1d8   :  { %v660_v57 = vmax.f32 %v658_v19, %v659_v28  ;;  %v728_v47 = vmax.f32 %v726_v21, %v727_v32  ;;  %v661_v29 = vsel %vm597_vm12, %v536_v39, -inf  ;;  %v844_v53 = vsel %vm772_vm14, %v2354_v44, %v843_v42  ;;  %1882 = vmatprep.subr.bf16.mxu1 %v1967_v30 }
 0x1d9   :  { %v723_v54 = vmax.f32 %v721_v25, %v722_v61  ;;  %v601_v36 = vrot.slane %v600_v41, 2  ;;  %v670_v45 = vmax.f32 %v668_v35, %v669_v48  ;;  %v662_v34 = vrot.slane %v661_v29, 4 }
 0x1da   :  { %v829_v38 = vsel %vm778_vm1, %v660_v57, %v828_v55  ;;  %v729_v46 = vrot.slane %v728_v47, 1  ;;  %v845_v44 = vsel %vm774_vm15, %v2370_v5, %v844_v53  ;;  %v753_v55 = vld [vmem:[%s2700_s2 + $0x78] sm:$0xff]  ;;  %v576_v1 = vcombine.high %v2424_v52, %v2424_v52  ;;  %v754_v52 = vld [vmem:[%s2700_s2 + $0x80] sm:$0xff] }
 0x1db   :  { %835 = vrot.lane.b32.xlu1 %v829_v38, %s1973_s18  ;;  %v816_v60 = vsel %vm778_vm1, %v723_v54, %v815_v16  ;;  %v833_v11 = vsel %vm776_vm0, %v723_v54, %v832_v23  ;;  %v602_v62 = vmax.f32 %v600_v41, %v601_v36  ;;  %v671_v2 = vrot.slane %v670_v45, 2  ;;  %1884 = vmatpush1.bf16.msra.mxu1 %v1883_v50  ;;  %v755_v23 = vld [vmem:[%s2700_s2 + $0x88] sm:$0xff] }
 0x1dc   :  { %819 = vrot.lane.b32.xlu0 %v816_v60, %s1972_s11  ;;  %v730_v4 = vmax.f32 %v728_v47, %v729_v46  ;;  %v663_v5 = vmax.f32 %v661_v29, %v662_v34  ;;  %v846_v6 = vsel %vm776_vm0, %v660_v57, %v845_v44  ;;  %v848_v12 = vsel %vm770_vm13, %v2426_v37, %v2415_v56 }
 0x1dd   :  { %v603_v7 = vrot.slane %v602_v62, 1  ;;  %v672_v10 = vmax.f32 %v670_v45, %v671_v2  ;;  %v849_v15 = vsel %vm772_vm14, %v2432_v0, %v848_v12  ;;  %v1886_v51 = vpack.c.bf16 %v753_v55, %v752_v3  ;;  %1885 = vmatprep.subr.bf16.mxu1 %v1967_v30 }
 0x1de   :  { %v834_v13 = vsel %vm778_vm1, %v730_v4, %v833_v11  ;;  %v664_v14 = vrot.slane %v663_v5, 2  ;;  %v731_v19 = vsel %vm597_vm12, %v576_v1, -inf  ;;  %v850_v21 = vsel %vm774_vm15, %v723_v54, %v849_v15 }
 0x1df   :  { %837 = vrot.lane.b32.xlu1 %v834_v13, %s1973_s18  ;;  %v604_v16 = vmax.f32 %v602_v62, %v603_v7  ;;  %v673_v18 = vrot.slane %v672_v10, 1  ;;  %v732_v0 = vrot.slane %v731_v19, 4  ;;  %v851_v25 = vsel %vm776_vm0, %v730_v4, %v850_v21  ;;  %1887 = vmatpush1.bf16.msra.mxu1 %v1886_v51  ;;  %v1298_v21 = vld [vmem:[%s2701_s3] sm:$0xff] }
 0x1e0   :  { %v665_v24 = vmax.f32 %v663_v5, %v664_v14  ;;  %v1889_v39 = vpack.c.bf16 %v755_v23, %v754_v52  ;;  %1888 = vmatprep.subr.bf16.mxu1 %v1967_v30  ;;  %v1299_v52 = vld [vmem:[%s2701_s3 + $0x8] sm:$0xff]  ;;  %v1300_v23 = vld [vmem:[%s2701_s3 + $0x10] sm:$0xff] }
 0x1e1   :  { %v771_v26 = vsel %vm770_vm13, %v2348_v33, %v604_v16  ;;  %v674_v17 = vmax.f32 %v672_v10, %v673_v18  ;;  %v733_v35 = vmax.f32 %v731_v19, %v732_v0  ;;  %v756_v33 = vld [vmem:[%s2700_s2 + $0x90] sm:$0xff]  ;;  %v1301_v0 = vld [vmem:[%s2701_s3 + $0x18] sm:$0xff] }
 0x1e2   :  { %v773_v28 = vsel %vm772_vm14, %v2345_v8, %v771_v26  ;;  %v666_v32 = vrot.slane %v665_v24, 1  ;;  %v757_v8 = vld [vmem:[%s2700_s2 + $0x98] sm:$0xff]  ;;  %v1040_v26 = vsub.s32 3, %v2159_v49 }
 0x1e3   :  { %v775_v61 = vsel %vm774_vm15, %v2352_v43, %v773_v28  ;;  %v780_v41 = vsel %vm770_vm13, %v2391_v20, %v674_v17  ;;  %v734_v57 = vrot.slane %v733_v35, 2  ;;  %1890 = vmatpush1.bf16.msra.mxu1 %v1889_v39  ;;  %v1892_v36 = vpack.c.bf16 %v757_v8, %v756_v33 }
 0x1e4   :  { %v777_v48 = vsel %vm776_vm0, %v2343_v27, %v775_v61  ;;  %v781_v42 = vsel %vm772_vm14, %v2401_v9, %v780_v41  ;;  %v667_v43 = vmax.f32 %v665_v24, %v666_v32  ;;  %1891 = vmatprep.subr.bf16.mxu1 %v1967_v30  ;;  %v1894_v24 = vpack.c.bf16 %v1299_v52, %v1298_v21 }
 0x1e5   :  { %v779_v20 = vsel %vm778_vm1, %v2350_v40, %v777_v48  ;;  %v782_v47 = vsel %vm774_vm15, %v2403_v22, %v781_v42  ;;  %v735_v54 = vmax.f32 %v733_v35, %v734_v57  ;;  %v1041_v17 = vrot.slane %v2165_v31, %v1040_v26 }
 0x1e6   :  { %v783_v29 = vsel %vm776_vm0, %v2415_v56, %v782_v47  ;;  %v847_v53 = vsel %vm778_vm1, %v667_v43, %v846_v6  ;;  %1895 = vmatprep.subr.bf16.mxu0 %v1894_v24 }
 0x1e7   :  { %v784_v27 = vsel %vm778_vm1, %v2426_v37, %v783_v29  ;;  %v736_v9 = vrot.slane %v735_v54, 1  ;;  %1893 = vmatpush1.bf16.msra.mxu1 %v1892_v36  ;;  %1897 = vmatpush3.bf16.msra.mxu0 %v1894_v24  ;;  %v1043_v28 = vcombine.high %v1041_v17, %v1041_v17  ;;  %v1050_v32 = vrot.slane %v1041_v17, %v2298_v63 }
 0x1e9   :  { %v737_v45 = vmax.f32 %v735_v54, %v736_v9  ;;  %v1057_v41 = vrot.slane %v1043_v28, %v2298_v63  ;;  %v1058_v8 = vcombine.high %v1050_v32, %v1050_v32 }
 0x1eb   :  { %v852_v40 = vsel %vm778_vm1, %v737_v45, %v851_v25  ;;  %v1898_v25 = vpack.c.bf16 %v1301_v0, %v1300_v23 }
 0x1ed   :  { %1899 = vmatprep.subr.bf16.mxu0 %v1898_v25 }
 0x1ee   :  { %1901 = vmatpush3.bf16.msra.mxu0 %v1898_v25 }
 0x237   :  { %v800_v34 = vpop.permute.xlu0 %799 }
 0x238   :  { %v818_v22 = vpop.permute.xlu1 %817  ;;  %v853_v56 = vsel %vm358_vm10, %v779_v20, %v800_v34 }
 0x239   :  { %v856_v59 = vsel %vm855_vm2, %v853_v56, %v818_v22 }
 0x246   :  { %v802_v58 = vpop.permute.xlu0 %801 }
 0x247   :  { %v854_v46 = vsel %vm358_vm10, %v784_v27, %v802_v58 }
 0x24d   :  { %v836_v38 = vpop.permute.xlu1 %835 }
 0x24e   :  { %v859_v44 = vsel %vm858_vm3, %v856_v59, %v836_v38  ;;  %v820_v37 = vpop.permute.xlu0 %819 }
 0x24f   :  { %v863_v60 = vcombine.low %v859_v44, %v847_v53  ;;  %v864_v30 = vcombine.high %v859_v44, %v847_v53  ;;  %v857_v11 = vsel %vm855_vm2, %v854_v46, %v820_v37 }
 0x251   :  { %v871_v62 = vrot.slane %v863_v60, %v2298_v63  ;;  %v838_v2 = vpop.permute.xlu1 %837  ;;  %v878_v6 = vrot.slane %v864_v30, %v2298_v63 }
 0x252   :  { %v860_v3 = vsel %vm858_vm3, %v857_v11, %v838_v2 }
 0x253   :  { %v879_v55 = vcombine.high %v871_v62, %v871_v62  ;;  %v880_v4 = vcombine.low %v860_v3, %v852_v40  ;;  %v881_v5 = vcombine.high %v860_v3, %v852_v40 }
 0x255   :  { %v888_v50 = vrot.slane %v880_v4, %v2298_v63  ;;  %v897_v7 = vcombine.low %v871_v62, %v879_v55  ;;  %v895_v10 = vrot.slane %v881_v5, %v2298_v63 }
 0x257   :  { %v896_v1 = vcombine.high %v888_v50, %v888_v50  ;;  %v898_v12 = vcombine.low %v878_v6, %v888_v50  ;;  %v905_v14 = vrot.slane %v897_v7, %v2298_v63 }
 0x259   :  { %v915_v13 = vcombine.low %v896_v1, %v895_v10  ;;  %v912_v15 = vrot.slane %v898_v12, %v2298_v63 }
 0x25b   :  { %v922_v51 = vrot.slane %v915_v13, %v2298_v63  ;;  %v914_v16 = vcombine.high %v905_v14, %v912_v15  ;;  %v913_v18 = vcombine.low %v905_v14, %v912_v15 }
 0x25d   :  { %1811 = vmatprep.mubr.msk.f32.mxu1 %vm358_vm10, %v914_v16  ;;  %v923_v19 = vcombine.high %v922_v51, %v922_v51 }
 0x25e   :  { %995 = vmatmul.mubr.f32.vlgmr.msra.gmra.mrb[0].mxu1 %v913_v18 }
 0x25f   :  { %1812 = vmatprep.mubr.msk.f32.mxu1 %vm358_vm10, %v923_v19 }
 0x262   :  { %1000 = vmatmul.mubr.f32.gmra.mrb[2].mxu1 %v922_v51 }
 0x331   :  { %v996_v35 = vpop.f32.mrb[0].mxu1 }
 0x332   :  { %v1007_v39 = vcombine.high %v996_v35, %v996_v35  ;;  %v1014_v61 = vrot.slane %v996_v35, %v2298_v63  ;;  %v998_v33 = vpop.f32.mrb[1].mxu1 }
 0x334   :  { %v1021_v48 = vrot.slane %v1007_v39, %v2298_v63  ;;  %v1022_v42 = vcombine.high %v1014_v61, %v1014_v61  ;;  %v1062_v43 = vadd.f32 %v1050_v32, %v1014_v61 }
 0x335   :  { %v1001_v57 = vpop.f32.mrb[2].mxu1 }
 0x336   :  { %v1023_v20 = vcombine.high %v1021_v48, %v1021_v48  ;;  %v1064_v47 = vadd.f32 %v1057_v41, %v1021_v48  ;;  %v1030_v31 = vrot.slane %v1001_v57, %v2298_v63  ;;  %v1003_v29 = vpop.f32.mrb[3].mxu1  ;;  %v2566_v53 = vmax.f32 %v1062_v43, 0.0 }
 0x337   :  { %v1063_v54 = vadd.f32 %v1058_v8, %v1022_v42 }
 0x338   :  { %v1065_v36 = vadd.f32 %v1050_v32, %v1023_v20  ;;  %v2568_v27 = vmax.f32 %v1064_v47, 0.0  ;;  %v1031_v9 = vcombine.high %v1030_v31, %v1030_v31  ;;  %v1066_v45 = vadd.f32 %v1058_v8, %v1030_v31 }
 0x339   :  { %v2570_v40 = vmax.f32 %v1063_v54, 0.0  ;;  %v1124_v56 = vmul.f32 %v2566_v53, %v2566_v53 }
 0x33a   :  { %v2572_v34 = vmax.f32 %v1065_v36, 0.0  ;;  %v1126_v22 = vmul.f32 %v2568_v27, %v2568_v27  ;;  %v1067_v58 = vadd.f32 %v1057_v41, %v1031_v9  ;;  %v2578_v59 = vmax.f32 %v1066_v45, 0.0 }
 0x33b   :  { %v1080_v38 = vcombine.low %v2566_v53, %v2570_v40  ;;  %v1125_v46 = vmul.f32 %v2570_v40, %v2570_v40  ;;  %v1094_v44 = vrot.slane %v2568_v27, %v2298_v63 }
 0x33c   :  { %v2586_v37 = vmax.f32 %v1067_v58, 0.0  ;;  %v1127_v60 = vmul.f32 %v2572_v34, %v2572_v34  ;;  %v1096_v11 = vcombine.low %v2572_v34, %v2578_v59  ;;  %v1128_v62 = vmul.f32 %v2578_v59, %v2578_v59 }
 0x33d   :  { %v1087_v30 = vrot.slane %v1080_v38, %v2298_v63  ;;  %v1136_v2 = vcombine.low %v1124_v56, %v1125_v46  ;;  %v1150_v3 = vrot.slane %v1126_v22, %v2298_v63  ;;  %v1240_v58 = vsub.s32 4, %v2159_v49 }
 0x33e   :  { %v1110_v55 = vrot.slane %v2586_v37, %v2298_v63  ;;  %v1129_v4 = vmul.f32 %v2586_v37, %v2586_v37  ;;  %v1103_v6 = vrot.slane %v1096_v11, %v2298_v63  ;;  %v1152_v7 = vcombine.low %v1127_v60, %v1128_v62 }
 0x33f   :  { %v1095_v5 = vcombine.low %v1087_v30, %v1094_v44  ;;  %v1143_v50 = vrot.slane %v1136_v2, %v2298_v63  ;;  %v1270_v56 = vsub.s32 5, %v2159_v49 }
 0x340   :  { %v1166_v10 = vrot.slane %v1129_v4, %v2298_v63  ;;  %v1111_v1 = vcombine.low %v1103_v6, %v1110_v55  ;;  %v1159_v13 = vrot.slane %v1152_v7, %v2298_v63 }
 0x341   :  { %v1151_v12 = vcombine.low %v1143_v50, %v1150_v3  ;;  %v1115_v14 = vsel %vm1114_vm4, %v1095_v5, 0.0 }
 0x342   :  { %v1116_v15 = vsel %vm1114_vm4, %v1111_v1, 0.0  ;;  %v1167_v51 = vcombine.low %v1159_v13, %v1166_v10 }
 0x343   :  { %v1117_v16 = vadd.f32 %v1116_v15, %v1115_v14  ;;  %v1170_v18 = vsel %vm1114_vm4, %v1151_v12, 0.0 }
 0x344   :  { %v1171_v19 = vsel %vm1114_vm4, %v1167_v51, 0.0 }
 0x345   :  { %v1118_v21 = vrot.slane %v1117_v16, 4  ;;  %v1172_v52 = vadd.f32 %v1171_v19, %v1170_v18 }
 0x347   :  { %v1119_v23 = vadd.f32 %v1118_v21, %v1117_v16  ;;  %v1173_v24 = vrot.slane %v1172_v52, 4 }
 0x349   :  { %v1120_v0 = vrot.slane %v1119_v23, 2  ;;  %v1174_v25 = vadd.f32 %v1173_v24, %v1172_v52 }
 0x34b   :  { %v1121_v26 = vadd.f32 %v1120_v0, %v1119_v23  ;;  %v1175_v17 = vrot.slane %v1174_v25, 2 }
 0x34d   :  { %v1122_v28 = vrot.slane %v1121_v26, 1  ;;  %v1176_v32 = vadd.f32 %v1175_v17, %v1174_v25 }
 0x34f   :  { %v1123_v35 = vadd.f32 %v1122_v28, %v1121_v26  ;;  %v1177_v39 = vrot.slane %v1176_v32, 1 }
 0x351   :  { %v1178_v61 = vadd.f32 %v1177_v39, %v1176_v32  ;;  %v1179_v41 = vmul.f32 0.083333336, %v1123_v35  ;;  %v1974_v35 = vmov 8   ;;  %v1447_v39 = vsub.s32 6, %v2159_v49 }
 0x352   :  { %1916 = vset.pattern.permute.xlu0 %v1974_v35  ;;  %1917 = vset.pattern.permute.xlu1 %v1974_v35 }
 0x353   :  { %v1180_v33 = vmul.f32 0.083333336, %v1178_v61  ;;  %v1181_v8 = vmul.f32 %v1179_v41, %v1179_v41  ;;  %v1185_v48 = vcombine.high %v1179_v41, %v1179_v41  ;;  %v1192_v42 = vrot.slane %v1179_v41, %v2298_v63 }
 0x355   :  { %v1182_v43 = vsub.f32 %v1180_v33, %v1181_v8  ;;  %v1199_v57 = vrot.slane %v1185_v48, %v2298_v63  ;;  %v1200_v20 = vcombine.high %v1192_v42, %v1192_v42  ;;  %v1204_v47 = vsub.f32 %v2566_v53, %v1192_v42  ;;  %v1938_v53 = vld [vmem:[%s2702_s4] sm:$0xff]  ;;  %s1976_s4 = smov [#allocation2]  }
 0x356   :  { %v1207_v31 = vsub.f32 %v2572_v34, %v1192_v42  ;;  %v1241_v34 = vrot.slane %v1938_v53, %v1240_v58  ;;  %v1271_v38 = vrot.slane %v1938_v53, %v1270_v56  ;;  %v1448_v61 = vrot.slane %v1938_v53, %v1447_v39  ;;  %s1797_s13 = sshll.u32 %s1976_s4, 4  ;;  %s1798_s13 = int_to_ptr.vmem [resolvable:$true] %s1797_s13 }
 0x357   :  { %v1183_v29 = vmax.f32 %v1182_v43, 0.0  ;;  %v1205_v54 = vsub.f32 %v2570_v40, %v1200_v20  ;;  %v1206_v36 = vsub.f32 %v2568_v27, %v1199_v57  ;;  %v1208_v9 = vsub.f32 %v2578_v59, %v1200_v20  ;;  %s1939_s0 = scalar_lea.vmem %s1798_s13, 32  ;;  %p1944_p1 = scmp.lt.s32.totalorder %s1798_s13, %s1798_s13 }
 0x358   :  { %v1209_v45 = vsub.f32 %v2586_v37, %v1199_v57  ;;  %v1243_v46 = vcombine.high %v1241_v34, %v1241_v34  ;;  %v1250_v40 = vrot.slane %v1241_v34, %v2298_v63  ;;  %v1273_v44 = vcombine.high %v1271_v38, %v1271_v38  ;;  %p1940_p0 = scmp.ne.s32.totalorder %s1798_s13, %s1939_s0  ;;  %p1945_p2 = scmp.lt.s32.totalorder %s1939_s0, %s1939_s0 }
 0x359   :  { %v1210_v22 = vadd.f32 1e-05, %v1183_v29  ;;  %v1280_v59 = vrot.slane %v1271_v38, %v2298_v63  ;;  %v1450_v41 = vcombine.high %v1448_v61, %v1448_v61  ;;  %v1457_v8 = vrot.slane %v1448_v61, %v2298_v63 }
 0x35a   :  { %v1257_v30 = vrot.slane %v1243_v46, %v2298_v63  ;;  %v1258_v11 = vcombine.high %v1250_v40, %v1250_v40  ;;  %v1287_v4 = vrot.slane %v1273_v44, %v2298_v63  ;;  %p1946_p3 = por %p1945_p2, %p1944_p1 }
 0x35b   :  { %1920 = vrsqrt.f32 %v1210_v22  ;;  %v1288_v5 = vcombine.high %v1280_v59, %v1280_v59  ;;  %v1464_v43 = vrot.slane %v1450_v41, %v2298_v63 }
 0x35c   :  { %p1947_p4 = pnand %p1946_p3, %p1940_p0 }
 0x365   :  { %v1921_v27 = vpop.eup %1920 }
 0x366   :  { %v1213_v37 = vcombine.high %v1921_v27, %v1921_v27  ;;  %v1220_v60 = vrot.slane %v1921_v27, %v2298_v63 }
 0x368   :  { %v1227_v62 = vrot.slane %v1213_v37, %v2298_v63  ;;  %v1228_v2 = vcombine.high %v1220_v60, %v1220_v60  ;;  %v1232_v3 = vmul.f32 %v1220_v60, %v1204_v47  ;;  %v1235_v55 = vmul.f32 %v1220_v60, %v1207_v31 }
 0x369   :  { %v1465_v31 = vcombine.high %v1457_v8, %v1457_v8 }
 0x36a   :  { %v1233_v6 = vmul.f32 %v1228_v2, %v1205_v54  ;;  %v1234_v50 = vmul.f32 %v1227_v62, %v1206_v36  ;;  %v1236_v7 = vmul.f32 %v1228_v2, %v1208_v9  ;;  %v1237_v10 = vmul.f32 %v1227_v62, %v1209_v45 }
 0x36b   :  { %v1262_v1 = vmul.f32 %v1250_v40, %v1232_v3  ;;  %v1265_v12 = vmul.f32 %v1250_v40, %v1235_v55 }
 0x36c   :  { %v1266_v13 = vmul.f32 %v1258_v11, %v1236_v7  ;;  %v1267_v14 = vmul.f32 %v1257_v30, %v1237_v10  ;;  %v1263_v15 = vmul.f32 %v1258_v11, %v1233_v6  ;;  %v1264_v51 = vmul.f32 %v1257_v30, %v1234_v50 }
 0x36d   :  { %v1292_v16 = vadd.f32 %v1280_v59, %v1262_v1  ;;  %v1295_v18 = vadd.f32 %v1280_v59, %v1265_v12 }
 0x36e   :  { %v1296_v19 = vadd.f32 %v1288_v5, %v1266_v13  ;;  %v1297_v21 = vadd.f32 %v1287_v4, %v1267_v14  ;;  %v1293_v52 = vadd.f32 %v1288_v5, %v1263_v15  ;;  %v1294_v23 = vadd.f32 %v1287_v4, %v1264_v51 }
 0x370   :  { %v1325_v24 = vcombine.low %v1296_v19, %v1297_v21  ;;  %v1308_v0 = vcombine.low %v1292_v16, %v1293_v52  ;;  %v1309_v25 = vcombine.low %v1294_v23, %v1295_v18 }
 0x372   :  { %v1316_v26 = vrot.slane %v1308_v0, %v2298_v63  ;;  %v1323_v17 = vrot.slane %v1309_v25, %v2298_v63  ;;  %v1332_v32 = vrot.slane %v1325_v24, %v2298_v63 }
 0x374   :  { %v1324_v28 = vcombine.low %v1316_v26, %v1323_v17 }
 0x376   :  { %1858 = vmatprep.mubr.msk.f32.mxu0 %vm358_vm10, %v1324_v28 }
 0x377   :  { %1859 = vmatmul.mubr.msk.f32.vlgmr.msra.gmra.mrb[10].mxu0 %vm358_vm10, %v1332_v32 }
 0x44a   :  { %v1860_v33 = vpop.f32.mrb[10].mxu0 }
 0x44b   :  { %v1437_v48 = vrot.slane %v1860_v33, %v2298_v63  ;;  %v1403_v42 = vpop.f32.mrb[11].mxu0 }
 0x44c   :  { %v1414_v57 = vcombine.high %v1403_v42, %v1403_v42  ;;  %v1421_v20 = vrot.slane %v1403_v42, %v2298_v63 }
 0x44d   :  { %v1438_v47 = vcombine.high %v1437_v48, %v1437_v48  ;;  %v2640_v58 = vadd.f32 %v1465_v31, %v1437_v48 }
 0x44e   :  { %v1428_v29 = vrot.slane %v1414_v57, %v2298_v63  ;;  %v1429_v54 = vcombine.high %v1421_v20, %v1421_v20  ;;  %v2634_v9 = vadd.f32 %v1457_v8, %v1421_v20 }
 0x44f   :  { %v2642_v56 = vadd.f32 %v1464_v43, %v1438_v47 }
 0x450   :  { %v1430_v36 = vcombine.high %v1428_v29, %v1428_v29  ;;  %v2636_v45 = vadd.f32 %v1465_v31, %v1429_v54  ;;  %v2638_v22 = vadd.f32 %v1464_v43, %v1428_v29 }
 0x451   :  { %v1511_v27 = vrot.slane %v2642_v56, %v2298_v63 }
 0x452   :  { %v2644_v53 = vadd.f32 %v1457_v8, %v1430_v36  ;;  %v1481_v34 = vcombine.low %v2634_v9, %v2636_v45  ;;  %v1495_v46 = vrot.slane %v2638_v22, %v2298_v63 }
 0x454   :  { %v1488_v38 = vrot.slane %v1481_v34, %v2298_v63  ;;  %v1497_v40 = vcombine.low %v2644_v53, %v2640_v58 }
 0x456   :  { %v1496_v44 = vcombine.low %v1488_v38, %v1495_v46  ;;  %v1504_v59 = vrot.slane %v1497_v40, %v2298_v63 }
 0x458   :  { %v1512_v37 = vcombine.low %v1504_v59, %v1511_v27  ;;  %v1516_v60 = vsel %vm1515_vm5, %v1496_v44, -inf }
 0x459   :  { %v1517_v30 = vrot.slane %v1516_v60, 4 }
 0x45a   :  { %v1523_v11 = vsel %vm1515_vm5, %v1512_v37, -inf }
 0x45b   :  { %v1518_v62 = vmax.f32 %v1516_v60, %v1517_v30  ;;  %v1524_v2 = vrot.slane %v1523_v11, 4 }
 0x45d   :  { %v1519_v3 = vrot.slane %v1518_v62, 2  ;;  %v1525_v55 = vmax.f32 %v1523_v11, %v1524_v2 }
 0x45f   :  { %v1520_v4 = vmax.f32 %v1518_v62, %v1519_v3  ;;  %v1526_v5 = vrot.slane %v1525_v55, 2 }
 0x461   :  { %v1521_v6 = vrot.slane %v1520_v4, 1  ;;  %v1527_v50 = vmax.f32 %v1525_v55, %v1526_v5 }
 0x463   :  { %v1522_v7 = vmax.f32 %v1520_v4, %v1521_v6  ;;  %v1528_v10 = vrot.slane %v1527_v50, 1 }
 0x465   :  { %v1529_v1 = vmax.f32 %v1527_v50, %v1528_v10  ;;  %v1532_v12 = vcombine.high %v1522_v7, %v1522_v7  ;;  %v1539_v13 = vrot.slane %v1522_v7, %v2298_v63  ;;  %v1975_v50 = vmov 269488144  }
 0x466   :  { %v1647_v7 = vunpack.c.l.s4 %v1975_v50 }
 0x467   :  { %v1546_v14 = vrot.slane %v1532_v12, %v2298_v63  ;;  %v1547_v15 = vcombine.high %v1539_v13, %v1539_v13  ;;  %v1548_v51 = vcombine.high %v1529_v1, %v1529_v1  ;;  %v1555_v16 = vrot.slane %v1529_v1, %v2298_v63 }
 0x468   :  { %v1570_v18 = vsub.f32 %v2634_v9, %v1539_v13  ;;  %v1648_v10 = vunpack.c.0.s8 %v1647_v7 }
 0x469   :  { %v1562_v19 = vrot.slane %v1548_v51, %v2298_v63  ;;  %v1563_v21 = vcombine.high %v1555_v16, %v1555_v16  ;;  %v1571_v52 = vsub.f32 %v2636_v45, %v1547_v15  ;;  %v1572_v23 = vsub.f32 %v2638_v22, %v1546_v14 }
 0x46a   :  { %v1573_v24 = vsub.f32 %v2644_v53, %v1555_v16  ;;  %v1576_v0 = vmul.f32 1.442695, %v1570_v18  ;;  %v1651_v1 = vsub.s32 %v1648_v10, %v2159_v49 }
 0x46b   :  { %v1574_v25 = vsub.f32 %v2640_v58, %v1563_v21  ;;  %v1575_v26 = vsub.f32 %v2642_v56, %v1562_v19  ;;  %v1578_v17 = vmul.f32 1.442695, %v1571_v52  ;;  %v1580_v28 = vmul.f32 1.442695, %v1572_v23 }
 0x46c   :  { %1922 = vpow2.f32 %v1576_v0  ;;  %v1582_v32 = vmul.f32 1.442695, %v1573_v24 }
 0x46d   :  { %1924 = vpow2.f32 %v1578_v17  ;;  %v1584_v35 = vmul.f32 1.442695, %v1574_v25  ;;  %v1586_v39 = vmul.f32 1.442695, %v1575_v26 }
 0x46e   :  { %1926 = vpow2.f32 %v1580_v28 }
 0x46f   :  { %1928 = vpow2.f32 %v1582_v32 }
 0x470   :  { %1930 = vpow2.f32 %v1584_v35 }
 0x471   :  { %1932 = vpow2.f32 %v1586_v39 }
 0x476   :  { %v1923_v61 = vpop.eup %1922 }
 0x477   :  { %v1925_v41 = vpop.eup %1924  ;;  %1643 = vperm.xlu0 %1916, %v1923_v61  }
 0x478   :  { %v1927_v33 = vpop.eup %1926  ;;  %v1594_v8 = vcombine.low %v1923_v61, %v1925_v41  ;;  %1654 = vperm.xlu1 %1917, %v1925_v41  }
 0x479   :  { %v1929_v48 = vpop.eup %1928  ;;  %v1608_v57 = vrot.slane %v1927_v33, %v2298_v63 }
 0x47a   :  { %v1931_v42 = vpop.eup %1930  ;;  %v1601_v43 = vrot.slane %v1594_v8, %v2298_v63 }
 0x47b   :  { %v1933_v20 = vpop.eup %1932  ;;  %v1610_v47 = vcombine.low %v1929_v48, %v1931_v42  ;;  %1687 = vperm.xlu0 %1916, %v1931_v42  }
 0x47c   :  { %v1609_v31 = vcombine.low %v1601_v43, %v1608_v57  ;;  %1676 = vperm.xlu1 %1917, %v1929_v48   ;;  %v1624_v54 = vrot.slane %v1933_v20, %v2298_v63 }
 0x47d   :  { %v1617_v29 = vrot.slane %v1610_v47, %v2298_v63 }
 0x47e   :  { %v1628_v36 = vsel %vm1515_vm5, %v1609_v31, 0.0 }
 0x47f   :  { %v1625_v34 = vcombine.low %v1617_v29, %v1624_v54  ;;  %v1629_v38 = vrot.slane %v1628_v36, 4  ;;  %1698 = vperm.xlu0 %1916, %v1933_v20  }
 0x480   :  { %1665 = vperm.xlu1 %1917, %v1927_v33  }
 0x481   :  { %v1630_v46 = vadd.f32 %v1629_v38, %v1628_v36  ;;  %v1635_v40 = vsel %vm1515_vm5, %v1625_v34, 0.0 }
 0x482   :  { %v1636_v27 = vrot.slane %v1635_v40, 4 }
 0x483   :  { %v1631_v44 = vrot.slane %v1630_v46, 2 }
 0x484   :  { %v1637_v59 = vadd.f32 %v1636_v27, %v1635_v40 }
 0x485   :  { %v1632_v37 = vadd.f32 %v1631_v44, %v1630_v46 }
 0x486   :  { %v1638_v60 = vrot.slane %v1637_v59, 2 }
 0x487   :  { %v1633_v30 = vrot.slane %v1632_v37, 1 }
 0x488   :  { %v1639_v11 = vadd.f32 %v1638_v60, %v1637_v59 }
 0x489   :  { %v1634_v62 = vadd.f32 %v1633_v30, %v1632_v37 }
 0x48a   :  { %v1640_v2 = vrot.slane %v1639_v11, 1 }
 0x48b   :  { %v1769_v3 = vmul.f32 6.0, %v1634_v62 }
 0x48c   :  { %v1641_v55 = vadd.f32 %v1640_v2, %v1639_v11 }
 0x48d   :  { %1934 = vrcp.f32 %v1769_v3 }
 0x48e   :  { %v1770_v4 = vmul.f32 6.0, %v1641_v55 }
 0x490   :  { %1936 = vrcp.f32 %v1770_v4 }
 0x497   :  { %v1935_v5 = vpop.eup %1934 }
 0x498   :  { %1775 = vperm.xlu1 %1917, %v1935_v5  }
 0x49a   :  { %v1937_v6 = vpop.eup %1936 }
 0x49b   :  { %1780 = vperm.xlu0 %1916, %v1937_v6  }
 0x4f6   :  { %v1644_v12 = vpop.permute.xlu0 %1643 }
 0x4f7   :  { %v1655_v13 = vpop.permute.xlu1 %1654  ;;  %v1652_v15 = vrot.slane %v1644_v12, %v1651_v1 }
 0x4f8   :  { %v1663_v14 = vrot.slane %v1655_v13, %v1651_v1 }
 0x4f9   :  { %v1708_v52 = vmul.f32 %v1652_v15, %v2634_v9 }
 0x4fa   :  { %v1688_v51 = vpop.permute.xlu0 %1687  ;;  %v1709_v19 = vmul.f32 %v1663_v14, %v2636_v45 }
 0x4fb   :  { %v1696_v16 = vrot.slane %v1688_v51, %v1651_v1  ;;  %v1677_v18 = vpop.permute.xlu1 %1676 }
 0x4fc   :  { %v1685_v21 = vrot.slane %v1677_v18, %v1651_v1  ;;  %v1720_v49 = vcombine.low %v1708_v52, %v1709_v19 }
 0x4fd   :  { %v1712_v23 = vmul.f32 %v1696_v16, %v2640_v58 }
 0x4fe   :  { %v1711_v24 = vmul.f32 %v1685_v21, %v2644_v53  ;;  %v1699_v0 = vpop.permute.xlu0 %1698  ;;  %v1727_v9 = vrot.slane %v1720_v49, %v2298_v63 }
 0x4ff   :  { %v1707_v25 = vrot.slane %v1699_v0, %v1651_v1  ;;  %v1666_v26 = vpop.permute.xlu1 %1665 }
 0x500   :  { %v1736_v17 = vcombine.low %v1711_v24, %v1712_v23  ;;  %v1674_v28 = vrot.slane %v1666_v26, %v1651_v1 }
 0x501   :  { %v1713_v32 = vmul.f32 %v1707_v25, %v2642_v56 }
 0x502   :  { %v1743_v35 = vrot.slane %v1736_v17, %v2298_v63  ;;  %v1710_v39 = vmul.f32 %v1674_v28, %v2638_v22 }
 0x503   :  { %v1750_v45 = vrot.slane %v1713_v32, %v2298_v63 }
 0x504   :  { %v1734_v58 = vrot.slane %v1710_v39, %v2298_v63 }
 0x505   :  { %v1751_v53 = vcombine.low %v1743_v35, %v1750_v45 }
 0x506   :  { %v1735_v61 = vcombine.low %v1727_v9, %v1734_v58 }
 0x507   :  { %v1762_v41 = vsel %vm1754_vm6, %v1751_v53, 0.0 }
 0x508   :  { %v1755_v33 = vsel %vm1754_vm6, %v1735_v61, 0.0  ;;  %v1763_v8 = vrot.slane %v1762_v41, 4 }
 0x509   :  { %v1756_v48 = vrot.slane %v1755_v33, 4 }
 0x50a   :  { %v1764_v42 = vadd.f32 %v1763_v8, %v1762_v41 }
 0x50b   :  { %v1757_v43 = vadd.f32 %v1756_v48, %v1755_v33 }
 0x50c   :  { %v1765_v57 = vrot.slane %v1764_v42, 2 }
 0x50d   :  { %v1758_v56 = vrot.slane %v1757_v43, 2 }
 0x50e   :  { %v1766_v47 = vadd.f32 %v1765_v57, %v1764_v42 }
 0x50f   :  { %v1759_v20 = vadd.f32 %v1758_v56, %v1757_v43 }
 0x510   :  { %v1767_v31 = vrot.slane %v1766_v47, 1 }
 0x511   :  { %v1760_v22 = vrot.slane %v1759_v20, 1 }
 0x512   :  { %v1768_v36 = vadd.f32 %v1767_v31, %v1766_v47 }
 0x513   :  { %v1761_v54 = vadd.f32 %v1760_v22, %v1759_v20 }
 0x517   :  { %v1776_v29 = vpop.permute.xlu1 %1775 }
 0x518   :  { %v1783_v34 = vmul.f32 %v1776_v29, %v1761_v54 }
 0x51a   :  { %v1781_v63 = vpop.permute.xlu0 %1780 }
 0x51b   :  { %v1784_v38 = vmul.f32 %v1781_v63, %v1768_v36 }
 0x51d   :  { %v1787_v46 = vsel %vm770_vm13, %v1784_v38, %v1783_v34 }
 0x51e   :  { %1790 = vst.msk [vmem:[#allocation2] sm:$0x3] %vm1789_vm7, %v1787_v46 }
 0x51f   :  { %1950 = shalt.err (!%p1947_p4)
}
 0x520   :  { %s1951_s16 = scalar_lea.hbm %s2703_s5, 32 }
 0x521   :  { %p1952_p5 = scmp.ne.s32.totalorder %s2703_s5, %s1951_s16  ;;  %p1955_p6 = scmp.lt.u32.totalorder %s1951_s16, %s2703_s5 }
 0x523   :  { %p1957_p7 = pnand %p1955_p6, %p1952_p5 }
 0x525   :  { %1960 = shalt.err (!%p1957_p7)
}
 0x526   :  { %1800 = dma.vmem_to_hbm [thread:$0]  %s1798_s13, 32, %s2703_s5, [#allocation3]  }
 0x527   :  { %1961 = dma.done.wait [#allocation3], 32  }
 0x528   :  { %1962 = vsyncadd [#allocation3], 4294967264 }
 0x529   :  { %1804 = vsyncpa [#allocation3], 1 }

</bundles_post_ra>
